<compile_context>
chip_gen: v7x
topology: tpu7x:2x2x1
jax: 0.10.0
libtpu: 0.0.40
codegen_flags: <defaults>
</compile_context>

<pallas_src>
import jax
import jax.numpy as jnp
import numpy as np
from jax.experimental import pallas as pl
from jax.experimental.pallas import tpu as pltpu


def _round_up(n, m):
    return ((n + m - 1) // m) * m


# --------------------------------------------------------------------------------------
# Kernel: one row-tile of the fused MLP.
#   x arrives in f32, weights in bf16, biases in f32.  Both matmuls run on the MXU
#   with bf16 inputs and f32 accumulation; bias add / ReLU / casts stay on the VPU.
# --------------------------------------------------------------------------------------
def _mlp_kernel(x_ref, w1_ref, b1_ref, w2_ref, b2_ref, out_ref):
    x = x_ref[...].astype(jnp.bfloat16)                                   # (TM, DIN)
    # Layer 1: bf16 MXU matmul, f32 accumulate; bias + ReLU in f32.
    h = jnp.dot(x, w1_ref[...], preferred_element_type=jnp.float32)       # (TM, DH)
    h = jnp.maximum(h + b1_ref[...], 0.0)
    # Layer 2: back to bf16 for the MXU, f32 accumulate + bias.
    y = jnp.dot(h.astype(jnp.bfloat16), w2_ref[...],
                preferred_element_type=jnp.float32) + b2_ref[...]         # (TM, DOUT)
    out_ref[...] = y.astype(out_ref.dtype)                                # lane-dense store


# --------------------------------------------------------------------------------------
# One-time parameter preparation (do NOT redo this per forward call).
# --------------------------------------------------------------------------------------
def prepare_params(w1, b1, w2, b2):
    """Cast/reshape the parameters once: bf16 (in, out) weights, (1, D) f32 biases."""
    return (jnp.asarray(w1, jnp.bfloat16),
            jnp.asarray(b1, jnp.float32).reshape(1, -1),
            jnp.asarray(w2, jnp.bfloat16),
            jnp.asarray(b2, jnp.float32).reshape(1, -1))


# --------------------------------------------------------------------------------------
# Wrapper: flatten leading dims (metadata only), pick a row tile, launch the grid,
# then reshape to (..., out_dim, 1, 1) to match mlp(x).unsqueeze(-1).unsqueeze(-1).
# --------------------------------------------------------------------------------------
def verb_embedding_mlp(x, prepared_params, *, tile_rows=512, out_dtype=jnp.float32):
    w1, b1, w2, b2 = prepared_params
    din, dh = w1.shape
    dout = w2.shape[1]
    assert x.shape[-1] == din, (x.shape, din)

    lead = x.shape[:-1]
    n = int(np.prod(lead)) if lead else 1
    x2 = x.reshape(n, din)                     # no dtype cast: kernel casts the VMEM tile

    # ---- Row-tile selection -----------------------------------------------------------
    GRANULE = 16                               # bf16 sublane packing for the in-kernel cast
    tile_rows = max(GRANULE, _round_up(int(tile_rows), GRANULE))
    # Aim for >= 2 row-blocks so the "parallel" axis can shard across both v7x TCs.
    tm = min(tile_rows, max(GRANULE, _round_up(pl.cdiv(n, 2), GRANULE)))
    if tm >= n:
        tm = n                                 # single full-extent block (always legal)
    grid = (pl.cdiv(n, tm),)                   # ragged last block is masked by Pallas

    x_bytes = x2.dtype.itemsize
    out_bytes = jnp.dtype(out_dtype).itemsize

    # ---- VMEM budget: double-buffered x/out tiles, resident bf16 weights, intermediates.
    vmem_est = (2 * tm * din * x_bytes                     # x tile (double-buffered)
                + 2 * tm * dout * out_bytes                # out tile (double-buffered)
                + 2 * 2 * (din * dh + dh * dout)           # bf16 weights (default 2 bufs)
                + 2 * 4 * (dh + dout)                      # f32 biases
                + tm * dh * (4 + 2) + tm * dout * 4)       # h (f32 + bf16 copy), y (f32)
    vmem_limit = int(min(64 << 20, max(32 << 20, int(1.5 * vmem_est))))

    cost = pl.CostEstimate(
        flops=2 * n * din * dh + 2 * n * dh * dout,
        transcendentals=0,
        bytes_accessed=(n * din * x_bytes                  # x read once, in f32
                        + 2 * (din * dh + dh * dout)       # bf16 weights
                        + 4 * (dh + dout)                  # f32 biases
                        + n * dout * out_bytes),           # output
    )

    out = pl.pallas_call(
        _mlp_kernel,
        out_shape=jax.ShapeDtypeStruct((n, dout), out_dtype),
        grid_spec=pltpu.PrefetchScalarGridSpec(
            num_scalar_prefetch=0,
            grid=grid,
            in_specs=[
                pl.BlockSpec((tm, din), lambda i: (i, 0)),    # x row tile (f32)
                pl.BlockSpec((din, dh), lambda i: (0, 0)),    # w1: constant -> stays resident
                pl.BlockSpec((1, dh), lambda i: (0, 0)),      # b1
                pl.BlockSpec((dh, dout), lambda i: (0, 0)),   # w2: constant -> stays resident
                pl.BlockSpec((1, dout), lambda i: (0, 0)),    # b2
            ],
            out_specs=pl.BlockSpec((tm, dout), lambda i: (i, 0)),
        ),
        compiler_params=pltpu.CompilerParams(
            dimension_semantics=("parallel",),
            vmem_limit_bytes=vmem_limit,
        ),
        cost_estimate=cost,
    )(x2, w1, b1, w2, b2)

    # .unsqueeze(-1).unsqueeze(-1) — pure metadata, done outside the kernel.
    return out.reshape(*lead, dout, 1, 1)


# --------------------------------------------------------------------------------------
# References (take the raw f32 parameters).
# --------------------------------------------------------------------------------------
def verb_embedding_mlp_ref_f32(x, raw_params):
    """Exact PyTorch-semantics reference (f32 throughout)."""
    w1, b1, w2, b2 = raw_params
    h = jnp.maximum(x @ w1 + b1, 0.0)
    y = h @ w2 + b2
    return y[..., None, None]


def verb_embedding_mlp_ref_bf16(x, raw_params):
    """Reference mirroring the kernel's mixed precision (bf16 MXU inputs, f32 acc)."""
    w1, b1, w2, b2 = raw_params
    h = jnp.dot(x.astype(jnp.bfloat16), w1.astype(jnp.bfloat16),
                preferred_element_type=jnp.float32) + b1
    h = jnp.maximum(h, 0.0)
    y = jnp.dot(h.astype(jnp.bfloat16), w2.astype(jnp.bfloat16),
                preferred_element_type=jnp.float32) + b2
    return y[..., None, None]


# --------------------------------------------------------------------------------------
if __name__ == "__main__":
    IN_DIM = 768     # module defaults
    OUT_DIM = 768
    B0, L = 5, 8     # 40 rows -> tm=32, grid=(2,), ragged 8-row tail block (no padding)

    key = jax.random.PRNGKey(0)
    k_x, k_w1, k_b1, k_w2, k_b2 = jax.random.split(key, 5)

    x = jax.random.normal(k_x, (B0, L, IN_DIM), dtype=jnp.float32)

    # Deterministic init; weights stored as (in, out) (transposed vs torch Linear.weight).
    w1 = jax.random.normal(k_w1, (IN_DIM, IN_DIM), dtype=jnp.float32) * (IN_DIM ** -0.5)
    b1 = jax.random.normal(k_b1, (IN_DIM,), dtype=jnp.float32) * 0.01
    w2 = jax.random.normal(k_w2, (IN_DIM, OUT_DIM), dtype=jnp.float32) * (IN_DIM ** -0.5)
    b2 = jax.random.normal(k_b2, (OUT_DIM,), dtype=jnp.float32) * 0.01

    raw_params = (w1, b1, w2, b2)
    params = prepare_params(*raw_params)     # one-time prep: bf16 weights, (1, D) f32 biases

    out = verb_embedding_mlp(x, params)      # default tile_rows=512, f32 output
    out = jax.block_until_ready(out)
    assert out.shape == (B0, L, OUT_DIM, 1, 1), out.shape

    # Tight check against a reference with identical mixed-precision choices.
    ref_bf16 = verb_embedding_mlp_ref_bf16(x, raw_params)
    np.testing.assert_allclose(np.asarray(out), np.asarray(ref_bf16),
                               rtol=2e-3, atol=2e-3)

    # Loose check against the exact f32 PyTorch-semantics reference (bf16 MXU rounding).
    ref_f32 = verb_embedding_mlp_ref_f32(x, raw_params)
    np.testing.assert_allclose(np.asarray(out), np.asarray(ref_f32),
                               rtol=5e-2, atol=5e-2)

    print("KERNEL_OK")
</pallas_src>

<mosaic_0001>
module attributes {stable_mosaic.version = 11 : i64} {
  func.func @_mlp_kernel(%arg0: i32, %arg1: memref<32x768xf32, #tpu.memory_space<vmem>>, %arg2: memref<768x768xbf16, #tpu.memory_space<vmem>>, %arg3: memref<1x768xf32, #tpu.memory_space<vmem>>, %arg4: memref<768x768xbf16, #tpu.memory_space<vmem>>, %arg5: memref<1x768xf32, #tpu.memory_space<vmem>>, %arg6: memref<32x768xf32, #tpu.memory_space<vmem>>) attributes {dimension_semantics = [#tpu.dimension_semantics<parallel>], iteration_bounds = array<i64: 2>, scalar_prefetch = 0 : i64, scratch_operands = 0 : i64, tpu.core_type = #tpu.core_type<tc>, window_params = [{transform_indices = @transform_0, window_bounds = array<i64: 32, 768>}, {pipeline_mode = #tpu.pipeline_mode<synchronous>, transform_indices = @transform_1, window_bounds = array<i64: 768, 768>}, {pipeline_mode = #tpu.pipeline_mode<synchronous>, transform_indices = @transform_2, window_bounds = array<i64: 1, 768>}, {pipeline_mode = #tpu.pipeline_mode<synchronous>, transform_indices = @transform_3, window_bounds = array<i64: 768, 768>}, {pipeline_mode = #tpu.pipeline_mode<synchronous>, transform_indices = @transform_4, window_bounds = array<i64: 1, 768>}, {transform_indices = @transform_5, window_bounds = array<i64: 32, 768>}]} {
    %c0 = arith.constant 0 : index
    %c0_0 = arith.constant 0 : index
    %0 = vector.load %arg1[%c0, %c0_0] : memref<32x768xf32, #tpu.memory_space<vmem>>, vector<32x768xf32>
    %1 = arith.truncf %0 : vector<32x768xf32> to vector<32x768xbf16>
    %c0_1 = arith.constant 0 : index
    %c0_2 = arith.constant 0 : index
    %2 = vector.load %arg2[%c0_1, %c0_2] : memref<768x768xbf16, #tpu.memory_space<vmem>>, vector<768x768xbf16>
    %cst = arith.constant dense<0.000000e+00> : vector<32x768xf32>
    %3 = tpu.matmul %1, %2, %cst {dimension_numbers = #tpu.dot_dimension_numbers<[1], [0], [0], [1], [0, 0, 1, 1], [], []>} : vector<32x768xbf16>, vector<768x768xbf16>, vector<32x768xf32> -> vector<32x768xf32>
    %c0_3 = arith.constant 0 : index
    %c0_4 = arith.constant 0 : index
    %4 = vector.load %arg3[%c0_3, %c0_4] : memref<1x768xf32, #tpu.memory_space<vmem>>, vector<1x768xf32>
    %5 = vector.broadcast %4 : vector<1x768xf32> to vector<32x768xf32>
    %6 = arith.addf %3, %5 : vector<32x768xf32>
    %cst_5 = arith.constant 0.000000e+00 : f32
    %7 = vector.broadcast %cst_5 : f32 to vector<32x768xf32>
    %8 = arith.maximumf %6, %7 : vector<32x768xf32>
    %9 = arith.truncf %8 : vector<32x768xf32> to vector<32x768xbf16>
    %c0_6 = arith.constant 0 : index
    %c0_7 = arith.constant 0 : index
    %10 = vector.load %arg4[%c0_6, %c0_7] : memref<768x768xbf16, #tpu.memory_space<vmem>>, vector<768x768xbf16>
    %cst_8 = arith.constant dense<0.000000e+00> : vector<32x768xf32>
    %11 = tpu.matmul %9, %10, %cst_8 {dimension_numbers = #tpu.dot_dimension_numbers<[1], [0], [0], [1], [0, 0, 1, 1], [], []>} : vector<32x768xbf16>, vector<768x768xbf16>, vector<32x768xf32> -> vector<32x768xf32>
    %c0_9 = arith.constant 0 : index
    %c0_10 = arith.constant 0 : index
    %12 = vector.load %arg5[%c0_9, %c0_10] : memref<1x768xf32, #tpu.memory_space<vmem>>, vector<1x768xf32>
    %13 = vector.broadcast %12 : vector<1x768xf32> to vector<32x768xf32>
    %14 = arith.addf %11, %13 : vector<32x768xf32>
    %c0_11 = arith.constant 0 : index
    %c0_12 = arith.constant 0 : index
    %15 = vector.load %arg6[%c0_11, %c0_12] : memref<32x768xf32, #tpu.memory_space<vmem>>, vector<32x768xf32>
    tpu.vector_store %arg6[%c0_11, %c0_12], %14 {strides = array<i32>} : memref<32x768xf32, #tpu.memory_space<vmem>>, vector<32x768xf32>,
    return
  }
  func.func @transform_0(%arg0: i32) -> (i32, i32) {
    %c0_i32 = arith.constant 0 : i32
    %c0_i32_0 = arith.constant 0 : i32
    return %arg0, %c0_i32 : i32, i32
  }
  func.func @transform_1(%arg0: i32) -> (i32, i32) {
    %c0_i32 = arith.constant 0 : i32
    %c0_i32_0 = arith.constant 0 : i32
    %c0_i32_1 = arith.constant 0 : i32
    return %c0_i32, %c0_i32_0 : i32, i32
  }
  func.func @transform_2(%arg0: i32) -> (i32, i32) {
    %c0_i32 = arith.constant 0 : i32
    %c0_i32_0 = arith.constant 0 : i32
    %c0_i32_1 = arith.constant 0 : i32
    return %c0_i32, %c0_i32_0 : i32, i32
  }
  func.func @transform_3(%arg0: i32) -> (i32, i32) {
    %c0_i32 = arith.constant 0 : i32
    %c0_i32_0 = arith.constant 0 : i32
    %c0_i32_1 = arith.constant 0 : i32
    return %c0_i32, %c0_i32_0 : i32, i32
  }
  func.func @transform_4(%arg0: i32) -> (i32, i32) {
    %c0_i32 = arith.constant 0 : i32
    %c0_i32_0 = arith.constant 0 : i32
    %c0_i32_1 = arith.constant 0 : i32
    return %c0_i32, %c0_i32_0 : i32, i32
  }
  func.func @transform_5(%arg0: i32) -> (i32, i32) {
    %c0_i32 = arith.constant 0 : i32
    %c0_i32_0 = arith.constant 0 : i32
    return %arg0, %c0_i32 : i32, i32
  }
}

</mosaic_0001>

<bundles_post_ra>
// kernel: tpu_custom_call.1
= control target key start
LH: loop header
LB: loop body
LE: loop exit
PB: predicated region body
PF: predicated region fallthrough
CT: control target
= control target key end

     0   :  { %s7500_s0 = inlined_call_operand.hbm [shape: f32[40,768], index: 0, kind: input, shape index: {}]   ;;  %s7501_s1 = inlined_call_operand.hbm [shape: bf16[768,768], index: 1, kind: input, shape index: {}]   ;;  %s7502_s2 = inlined_call_operand.hbm [shape: f32[1,768], index: 2, kind: input, shape index: {}]   ;;  %s7503_s3 = inlined_call_operand.hbm [shape: bf16[768,768], index: 3, kind: input, shape index: {}]   ;;  %s7504_s4 = inlined_call_operand.hbm [shape: f32[1,768], index: 4, kind: input, shape index: {}]   ;;  %s7505_s5 = inlined_call_operand.hbm [shape: f32[40,768], index: 5, kind: output, shape index: {}]  }
   0x1   :  { %7512 = sst [smem:[#allocation19_spill]] %s7501_s1 }
   0x2   :  { %10 = vsyncpa [#allocation3], 0 }
   0x3   :  { %12 = vsyncpa [#allocation3 + $0x1], 0 }
   0x4   :  { %13 = vsyncpa [#allocation6], 0 }
   0x5   :  { %14 = vsyncpa [#allocation9], 0 }
   0x6   :  { %15 = vsyncpa [#allocation4], 0 }
   0x7   :  { %17 = vsyncpa [#allocation4 + $0x1], 0  ;;  %s6980_s18 = smov 0   ;;  %s6982_s19 = smov 0  }
   0x8   :  { %s6984_s20 = smov 0   ;;  %s6986_s21 = smov 0  }
   0x9 LB: > { %s7001_s22 = sadd.s32 4294967295, %s6936_s21   ;;  %s5020_s23 = sadd.s32 4294967294, %s6936_s21   ;;  %s6936_s21 = sphi %s6986_s21, %s7534_s21   ;;  %s6932_s20 = sphi %s6984_s20, %s7538_s20   ;;  %s6928_s19 = sphi %s6982_s19, %s7537_s19   ;;  %s6924_s18 = sphi %s6980_s18, %s7536_s18  }
   0xa   : > { %s7005_s24 = sadd.s32 1, %s6936_s21   ;;  %s30_s25 = sadd.s32 1, %s6932_s20 }
   0xb   : > { %7513 = sst [smem:[#allocation16_spill]] %s7005_s24  ;;  %s27_s26 = ssub.s32 %s6936_s21, %s7005_s24 }
   0xc   : > { %p37_p0 = scmp.ne.s32.totalorder %s6932_s20, %s6928_s19  ;;  %p28_p1 = scmp.eq.s32.totalorder %s27_s26, 0 }
   0xd   : > { %p38_p2 = scmp.eq.s32.totalorder %s6936_s21, 0  ;;  %p43_p3 = scmp.ne.s32.totalorder %s6928_s19, %s6924_s18 }
   0xe   : > { %p7506_p4 = scmp.eq.s32.totalorder %s7001_s22, 0  ;;  %p151_p7 = scmp.eq.s32.totalorder %s7001_s22, 1 }
   0xf   : > { %s7017_s27 = scalar_select %p28_p1, %s6932_s20, %s30_s25  }
  0x10   : > { %p7019_p5 = por %p38_p2, %p37_p0  ;;  %p7025_p6 = por %p7506_p4, %p43_p3 }
  0x11   : > { %7514 = sst [smem:[#allocation17_spill]] %s7017_s27  ;;  %p157_p8 = scmp.eq.s32.totalorder %s5020_s23, 1 }
  0x12   : > { %s7515_s28 = scalar_select %p7019_p5, 1, 0 }
  0x13   : > { %s7516_s29 = scalar_select %p7025_p6, 1, 0 }
  0x14   : > { %p5021_p9 = scmp.ge.s32.totalorder %s6936_s21, 1  ;;  %p164_p10 = scmp.lt.s32.totalorder %s6936_s21, 3 }
  0x15   : > { %p7032_p11 = por %p151_p7, %p37_p0  ;;  %p7036_p12 = por %p157_p8, %p43_p3 }
  0x16   : > { %p7040_p13 = pnand %p5021_p9, %p164_p10  ;;  %s6938_s8 = smov [#allocation5]  }
  0x17   : > { %s7517_s30 = scalar_select %p7032_p11, 1, 0 }
  0x18   : > { %s7518_s6 = scalar_select %p7036_p12, 1, 0 }
  0x19   : > { %s7520_s7 = scalar_select %p7040_p13, 1, 0 }
  0x1a   : > { %7519 = sst [smem:[#allocation18_spill]] %s7518_s6  ;;  %p5790_p1 = pneg %p7040_p13 }
  0x1b   : > { %s176_s9 = sshll.u32 %s6938_s8, 4  ;;  %s6939_s11 = smov [#allocation8]   ;;  %s177_s9 = int_to_ptr.vmem [resolvable:$true] %s176_s9 }
  0x1c   : > { %p7048_p2 = pnand %p5790_p1, %p7506_p4  ;;  %s200_s12 = sshll.u32 %s6939_s11, 4  ;;  %s7052_s12 = int_to_ptr.vmem [resolvable:$true] %s200_s12 }
  0x1d   : > { %s7522_s1 = sld [smem:[#allocation19_spill]] }
  0x1e   : > { %p7062_p3 = pneg %p7048_p2 }
  0x23   : > { %s6722_s15 = scalar_lea.hbm %s7522_s1, 36864 }
  0x24   : > { %p6723_p0 = scmp.ne.s32.totalorder %s7522_s1, %s6722_s15  ;;  %p6729_p9 = scmp.lt.u32.totalorder %s6722_s15, %s7522_s1 }
  0x26   : > { %p6725_p7 = pnand %p7062_p3, %p6723_p0 }
  0x28   : > { %p6726_p8 = pneg %p6725_p7 }
  0x2a   : > { %p6731_p10 = pnand %p6729_p9, %p6726_p8 }
  0x2c   : > { %6734 = shalt.err (!%p6731_p10)
}
  0x2d   : > { %s6735_s8 = scalar_lea.vmem %s177_s9, 36864  ;;  %p6743_p11 = scmp.lt.s32.totalorder %s177_s9, %s177_s9 }
  0x2e   : > { %p6736_p1 = scmp.ne.s32.totalorder %s177_s9, %s6735_s8  ;;  %p6744_p6 = scmp.lt.s32.totalorder %s6735_s8, %s6735_s8 }
  0x30   : > { %p6738_p4 = pnand %p6736_p1, %p7062_p3  ;;  %p6745_p13 = por %p6744_p6, %p6743_p11 }
  0x32   : > { %p6739_p12 = pneg %p6738_p4 }
  0x34   : > { %p6746_p5 = pnand %p6745_p13, %p6739_p12 }
  0x36   : > { %6749 = shalt.err (!%p6746_p5)
}
  0x37   : > { %s6940_s11 = smov 384   ;;  %s6941_s13 = smov 24  }
  0x38   : > { %5793 = dma.hbm_to_vmem [thread:$0]  (!%p7048_p2), %s7522_s1, 36864, %s177_s9, [#allocation6], %s6940_s11, %s6940_s11, %s6941_s13  }
  0x39   : > { %s6750_s25 = scalar_lea.hbm %s7503_s3, 36864 }
  0x3a   : > { %p6751_p4 = scmp.ne.s32.totalorder %s7503_s3, %s6750_s25  ;;  %p6757_p11 = scmp.lt.u32.totalorder %s6750_s25, %s7503_s3 }
  0x3c   : > { %p6753_p6 = pnand %p6751_p4, %p7062_p3 }
  0x3e   : > { %p6754_p5 = pneg %p6753_p6 }
  0x40   : > { %p6759_p12 = pnand %p6757_p11, %p6754_p5 }
  0x42   : > { %6762 = shalt.err (!%p6759_p12)
}
  0x43   : > { %s6763_s9 = scalar_lea.vmem %s7052_s12, 36864  ;;  %p6771_p8 = scmp.lt.s32.totalorder %s7052_s12, %s7052_s12 }
  0x44   : > { %p6764_p13 = scmp.ne.s32.totalorder %s7052_s12, %s6763_s9  ;;  %p6772_p9 = scmp.lt.s32.totalorder %s6763_s9, %s6763_s9 }
  0x46   : > { %p6766_p0 = pnand %p6764_p13, %p7062_p3  ;;  %p6773_p10 = por %p6772_p9, %p6771_p8 }
  0x48   : > { %p6767_p7 = pneg %p6766_p0 }
  0x4a   : > { %p6774_p1 = pnand %p6773_p10, %p6767_p7 }
  0x4c   : > { %6777 = shalt.err (!%p6774_p1)
}
  0x4d   : > { %5799 = dma.hbm_to_vmem [thread:$0]  (!%p7048_p2), %s7503_s3, 36864, %s7052_s12, [#allocation9], %s6940_s11, %s6940_s11, %s6941_s13  }
  0x4e   : > { %s6942_s14 = smov [#allocation7]   ;;  %s6943_s16 = smov [#allocation10]  }
  0x4f   : > { %s190_s15 = sshll.u32 %s6942_s14, 4  ;;  %s214_s17 = sshll.u32 %s6943_s16, 4  ;;  %s191_s15 = int_to_ptr.vmem [resolvable:$true] %s190_s15  ;;  %s215_s17 = int_to_ptr.vmem [resolvable:$true] %s214_s17 }
  0x50   : > { %s6778_s8 = scalar_lea.hbm %s7502_s2, 96 }
  0x51   : > { %p6779_p4 = scmp.ne.s32.totalorder %s7502_s2, %s6778_s8  ;;  %p6785_p11 = scmp.lt.u32.totalorder %s6778_s8, %s7502_s2 }
  0x53   : > { %p6781_p6 = pnand %p6779_p4, %p7062_p3 }
  0x55   : > { %p6782_p5 = pneg %p6781_p6 }
  0x57   : > { %p6787_p12 = pnand %p6785_p11, %p6782_p5 }
  0x59   : > { %6790 = shalt.err (!%p6787_p12)
}
  0x5a   : > { %s6791_s12 = scalar_lea.vmem %s191_s15, 96  ;;  %p6799_p8 = scmp.lt.s32.totalorder %s191_s15, %s191_s15 }
  0x5b   : > { %p6792_p13 = scmp.ne.s32.totalorder %s191_s15, %s6791_s12  ;;  %p6800_p9 = scmp.lt.s32.totalorder %s6791_s12, %s6791_s12 }
  0x5d   : > { %p6794_p0 = pnand %p6792_p13, %p7062_p3  ;;  %p6801_p10 = por %p6800_p9, %p6799_p8 }
  0x5f   : > { %p6795_p7 = pneg %p6794_p0 }
  0x61   : > { %p6802_p1 = pnand %p6801_p10, %p6795_p7 }
  0x63   : > { %6805 = shalt.err (!%p6802_p1)
}
  0x64   : > { %5796 = dma.hbm_to_vmem [thread:$0]  (!%p7048_p2), %s7502_s2, 96, %s191_s15, [#allocation6]  }
  0x65   : > { %s6806_s27 = scalar_lea.hbm %s7504_s4, 96 }
  0x66   : > { %p6807_p4 = scmp.ne.s32.totalorder %s7504_s4, %s6806_s27  ;;  %p6813_p11 = scmp.lt.u32.totalorder %s6806_s27, %s7504_s4 }
  0x68   : > { %p6809_p6 = pnand %p6807_p4, %p7062_p3 }
  0x6a   : > { %p6810_p5 = pneg %p6809_p6 }
  0x6c   : > { %p6815_p12 = pnand %p6813_p11, %p6810_p5 }
  0x6e   : > { %6818 = shalt.err (!%p6815_p12)
}
  0x6f   : > { %s6819_s8 = scalar_lea.vmem %s215_s17, 96  ;;  %p6827_p8 = scmp.lt.s32.totalorder %s215_s17, %s215_s17 }
  0x70   : > { %p6820_p13 = scmp.ne.s32.totalorder %s215_s17, %s6819_s8  ;;  %p6828_p9 = scmp.lt.s32.totalorder %s6819_s8, %s6819_s8 }
  0x72   : > { %p6822_p0 = pnand %p6820_p13, %p7062_p3  ;;  %p6829_p10 = por %p6828_p9, %p6827_p8 }
  0x74   : > { %p6823_p7 = pneg %p6822_p0 }
  0x76   : > { %p6830_p1 = pnand %p6829_p10, %p6823_p7 }
  0x78   : > { %6833 = shalt.err (!%p6830_p1)
}
  0x79   : > { %5802 = dma.hbm_to_vmem [thread:$0]  (!%p7048_p2), %s7504_s4, 96, %s215_s17, [#allocation9]  }
  0x7a   : > { %p5026_p4 = scmp.ge.s32.totalorder %s6936_s21, 2 }
  0x7b   : > { %p7524_p6 = scmp.ne.s32.totalorder (!%p5026_p4), %s7515_s28, 0 }
  0x7c   : > { %221 = sbr.rel (%p5026_p4) target bundleno = 167 (0xa7), region = 32 }
  0x83   : > { %224 = sbr.rel (!%p7524_p6) target bundleno = 167 (0xa7), region = 36  ;;  %s225_s23 = sand.u32 (%p7524_p6), 1, %s6932_s20  }
  0x84   : > { %s5027_s24 = sshll.u32 (%p7524_p6), %s6936_s21, 2  ;;  %s5768_s12 = smul.u32 (%p7524_p6), 192, %s225_s23 }
  0x85   : > { %s231_s1 = ssub.s32 (%p7524_p6), 5, %s5027_s24  ;;  %s7147_s11 = scalar_lea.sflag (%p7524_p6), [#allocation3], %s225_s23 }
  0x86   : > { %p232_p3 = scmp.lt.s32.totalorder (%p7524_p6), %s231_s1, 4  ;;  %s229_s6 = scalar_lea.vmem (%p7524_p6), [#allocation2], %s5768_s12 }
  0x8a   : > { %s7540_s1 = smov (!%p232_p3, %s231_s1), 4 }
  0x8b   : > { %s7144_s10 = smul.u32 768, %s7540_s1 }
  0x8d   : > { %s237_s17 = ssub.s32 3072, %s7144_s10 }
  0x8e   : > { %238 = vsyncadd %s7147_s11, %s237_s17  ;;  %p5030_p2 = scmp.ne.s32.totalorder %s7144_s10, 0  ;;  %s5769_s28 = smul.u32 3072, %s6936_s21 }
  0x8f   : > { %s244_s13 = sshll.u32 %s229_s6, 4  ;;  %s6838_s15 = scalar_lea.hbm %s7500_s0, 3840  ;;  %s7157_s13 = int_to_ptr.vmem [resolvable:$true] %s244_s13 }
  0x90   : > { %s7155_s16 = scalar_lea.hbm %s7500_s0, %s5769_s28 }
  0x91   : > { %s6834_s25 = scalar_lea.hbm %s7155_s16, %s7144_s10  ;;  %p6839_p13 = scmp.lt.u32.totalorder %s7155_s16, %s7500_s0 }
  0x92   : > { %p6835_p5 = scmp.ne.s32.totalorder %s7155_s16, %s6834_s25  ;;  %p6840_p0 = scmp.lt.u32.totalorder %s6838_s15, %s6834_s25 }
  0x93   : > { %p6842_p8 = scmp.lt.u32.totalorder %s6834_s25, %s7155_s16 }
  0x94   : > { %p6836_p11 = pnand %p6835_p5, %p5030_p2  ;;  %p6841_p7 = por %p6840_p0, %p6839_p13 }
  0x96   : > { %p6837_p12 = pneg %p6836_p11  ;;  %p6843_p9 = por %p6842_p8, %p6841_p7 }
  0x98   : > { %p6844_p10 = pnand %p6843_p9, %p6837_p12 }
  0x9a   : > { %6847 = shalt.err (!%p6844_p10)
}
  0x9b   : > { %s6848_s24 = scalar_lea.vmem %s7157_s13, %s7144_s10  ;;  %s6944_s12 = smov [#allocation2]  }
  0x9c   : > { %p6849_p1 = scmp.ne.s32.totalorder %s7157_s13, %s6848_s24  ;;  %s6852_s1 = sshll.u32 %s6944_s12, 4  ;;  %s6853_s1 = int_to_ptr.vmem [resolvable:$false] %s6852_s1 }
  0x9d   : > { %s6854_s17 = scalar_lea.vmem %s6853_s1, 6144  ;;  %p6855_p5 = scmp.lt.s32.totalorder %s7157_s13, %s6853_s1 }
  0x9e   : > { %p6850_p6 = pnand %p6849_p1, %p5030_p2  ;;  %p6856_p11 = scmp.lt.s32.totalorder %s6854_s17, %s6848_s24 }
  0xa0   : > { %p6851_p3 = pneg %p6850_p6  ;;  %p6857_p13 = por %p6856_p11, %p6855_p5 }
  0xa2   : > { %p6858_p0 = pnand %p6857_p13, %p6851_p3 }
  0xa4   : > { %6861 = shalt.err (!%p6858_p0)
}
  0xa5   : > { %s6945_s6 = smov 768   ;;  %s6946_s28 = smov 48  }
  0xa6   : > { %250 = dma.hbm_to_vmem [thread:$0]  (%p5030_p2), %s7155_s16, %s7144_s10, %s7157_s13, %s7147_s11, %s6945_s6, %s6945_s6, %s6946_s28  }
  0xa7 PF: > { %p7525_p12 = scmp.ne.s32.totalorder %s7520_s7, 0 }
  0xa8   : > { %s7187_s27 = sand.u32 (!%p7525_p12), 1, %s6928_s19   ;;  %p7526_p7 = scmp.ne.s32.totalorder (!%p7525_p12), %s7516_s29, 0 }
  0xa9   : > { %256 = sbr.rel (%p7525_p12) target bundleno = 1237 (0x4d5), region = 40  ;;  %s259_s25 = scalar_lea.sflag (!%p7525_p12), [#allocation3], %s7187_s27 }
  0xaa   : > { %s5770_s14 = smul.u32 (!%p7525_p12), 192, %s7187_s27 }
  0xac   : > { %s7193_s26 = scalar_lea.vmem (!%p7525_p12), [#allocation2], %s5770_s14 }
  0xb0   : > { %6907 = dma.done.wait (%p7526_p7), %s259_s25, 3072  }
  0xb1   : > { %6909 = vsyncadd (%p7526_p7), %s259_s25, 4294964224  ;;  %p7527_p2 = scmp.eq.s32.totalorder %s7001_s22, 0 }
  0xb3   : > { %6911 = dma.done.wait (%p7527_p2), [#allocation6], 36960   ;;  %p7528_p8 = pmov %p7527_p2 }
  0xb4   : > { %p7529_p9 = pmov %p7527_p2 }
  0xb5   : > { %6913 = vsyncadd (%p7528_p8), [#allocation6], 4294930336 }
  0xb6   : > { %6915 = dma.done.wait (%p7529_p9), [#allocation9], 36960   ;;  %p7530_p10 = pmov %p7527_p2 }
  0xb7   : > { %v5858_v0 = vld [vmem:[#allocation5 + $0x4] ss:$24 sps:$4 sm:$0xff]   ;;  %v5862_v2 = vld [vmem:[#allocation5] ss:$24 sps:$4 sm:$0xff]   ;;  %v5864_v4 = vld [vmem:[#allocation5 + $0x34] ss:$24 sps:$4 sm:$0xff]  }
  0xb8   : > { %6917 = vsyncadd (%p7530_p10), [#allocation9], 4294930336  ;;  %v5860_v1 = vld [vmem:[#allocation5 + $0xc] ss:$24 sps:$4 sm:$0xff]   ;;  %2113 = vmatprep.subr.bf16.mxu0 %v5858_v0  ;;  %v5863_v3 = vld [vmem:[#allocation5 + $0x8] ss:$24 sps:$4 sm:$0xff]  }
  0xb9   : > { %2272 = vmatprep.subr.bf16.mxu1 %v5860_v1  ;;  %2114 = vmatpush1.bf16.msra.mxu0 %v5862_v2  ;;  %v5866_v5 = vld [vmem:[#allocation5 + $0x3c] ss:$24 sps:$4 sm:$0xff]   ;;  %v5868_v6 = vld [vmem:[#allocation5 + $0x30] ss:$24 sps:$4 sm:$0xff]   ;;  %v5872_v9 = vld [vmem:[#allocation5 + $0x6c] ss:$24 sps:$4 sm:$0xff]  }
  0xba   : > { %2273 = vmatpush1.bf16.msra.mxu1 %v5863_v3  ;;  %2115 = vmatprep.subr.bf16.mxu0 %v5864_v4  ;;  %v5869_v7 = vld [vmem:[#allocation5 + $0x38] ss:$24 sps:$4 sm:$0xff]   ;;  %v5870_v8 = vld [vmem:[#allocation5 + $0x64] ss:$24 sps:$4 sm:$0xff]   ;;  %v5875_v11 = vld [vmem:[#allocation5 + $0x68] ss:$24 sps:$4 sm:$0xff]  }
  0xbb   : > { %2274 = vmatprep.subr.bf16.mxu1 %v5866_v5  ;;  %v5874_v10 = vld [vmem:[#allocation5 + $0x60] ss:$24 sps:$4 sm:$0xff]   ;;  %v5876_v12 = vld [vmem:[#allocation5 + $0x94] ss:$24 sps:$4 sm:$0xff]   ;;  %v5880_v14 = vld [vmem:[#allocation5 + $0x90] ss:$24 sps:$4 sm:$0xff]  }
  0xbc   : > { %v5878_v13 = vld [vmem:[#allocation5 + $0x9c] ss:$24 sps:$4 sm:$0xff]   ;;  %v5881_v15 = vld [vmem:[#allocation5 + $0x98] ss:$24 sps:$4 sm:$0xff]   ;;  %v5884_v17 = vld [vmem:[#allocation5 + $0xcc] ss:$24 sps:$4 sm:$0xff]  }
  0xbd   : > { %2116 = vmatpush1.bf16.msra.mxu0 %v5868_v6  ;;  %v5882_v16 = vld [vmem:[#allocation5 + $0xc4] ss:$24 sps:$4 sm:$0xff]   ;;  %v5886_v18 = vld [vmem:[#allocation5 + $0xc0] ss:$24 sps:$4 sm:$0xff]   ;;  %v5888_v20 = vld [vmem:[#allocation5 + $0xf4] ss:$24 sps:$4 sm:$0xff]  }
  0xbe   : > { %2275 = vmatpush1.bf16.msra.mxu1 %v5869_v7  ;;  %2117 = vmatprep.subr.bf16.mxu0 %v5870_v8  ;;  %v5887_v19 = vld [vmem:[#allocation5 + $0xc8] ss:$24 sps:$4 sm:$0xff]   ;;  %v5890_v21 = vld [vmem:[#allocation5 + $0xfc] ss:$24 sps:$4 sm:$0xff]   ;;  %v5893_v23 = vld [vmem:[#allocation5 + $0xf8] ss:$24 sps:$4 sm:$0xff]  }
  0xbf   : > { %2276 = vmatprep.subr.bf16.mxu1 %v5872_v9  ;;  %v5892_v22 = vld [vmem:[#allocation5 + $0xf0] ss:$24 sps:$4 sm:$0xff]   ;;  %v5894_v24 = vld [vmem:[#allocation5 + $0x124] ss:$24 sps:$4 sm:$0xff]   ;;  %v5898_v26 = vld [vmem:[#allocation5 + $0x120] ss:$24 sps:$4 sm:$0xff]  }
  0xc0   : > { %v5896_v25 = vld [vmem:[#allocation5 + $0x12c] ss:$24 sps:$4 sm:$0xff]   ;;  %v5899_v27 = vld [vmem:[#allocation5 + $0x128] ss:$24 sps:$4 sm:$0xff]   ;;  %v5902_v29 = vld [vmem:[#allocation5 + $0x15c] ss:$24 sps:$4 sm:$0xff]  }
  0xc1   : > { %2118 = vmatpush1.bf16.msra.mxu0 %v5874_v10  ;;  %v5900_v28 = vld [vmem:[#allocation5 + $0x154] ss:$24 sps:$4 sm:$0xff]   ;;  %v5904_v30 = vld [vmem:[#allocation5 + $0x150] ss:$24 sps:$4 sm:$0xff]   ;;  %v5906_v32 = vld [vmem:[#allocation5 + $0x184] ss:$24 sps:$4 sm:$0xff]  }
  0xc2   : > { %2277 = vmatpush1.bf16.msra.mxu1 %v5875_v11  ;;  %2119 = vmatprep.subr.bf16.mxu0 %v5876_v12  ;;  %v5905_v31 = vld [vmem:[#allocation5 + $0x158] ss:$24 sps:$4 sm:$0xff]   ;;  %v5908_v33 = vld [vmem:[#allocation5 + $0x18c] ss:$24 sps:$4 sm:$0xff]   ;;  %v5911_v35 = vld [vmem:[#allocation5 + $0x188] ss:$24 sps:$4 sm:$0xff]  }
  0xc3   : > { %2278 = vmatprep.subr.bf16.mxu1 %v5878_v13  ;;  %v5910_v34 = vld [vmem:[#allocation5 + $0x180] ss:$24 sps:$4 sm:$0xff]   ;;  %v5912_v36 = vld [vmem:[#allocation5 + $0x1b4] ss:$24 sps:$4 sm:$0xff]   ;;  %v5916_v38 = vld [vmem:[#allocation5 + $0x1b0] ss:$24 sps:$4 sm:$0xff]  }
  0xc4   : > { %v5914_v37 = vld [vmem:[#allocation5 + $0x1bc] ss:$24 sps:$4 sm:$0xff]   ;;  %v5917_v39 = vld [vmem:[#allocation5 + $0x1b8] ss:$24 sps:$4 sm:$0xff]   ;;  %v5920_v41 = vld [vmem:[#allocation5 + $0x1ec] ss:$24 sps:$4 sm:$0xff]  }
  0xc5   : > { %2120 = vmatpush1.bf16.msra.mxu0 %v5880_v14  ;;  %v5918_v40 = vld [vmem:[#allocation5 + $0x1e4] ss:$24 sps:$4 sm:$0xff]   ;;  %v5922_v42 = vld [vmem:[#allocation5 + $0x1e0] ss:$24 sps:$4 sm:$0xff]   ;;  %v5924_v44 = vld [vmem:[#allocation5 + $0x214] ss:$24 sps:$4 sm:$0xff]  }
  0xc6   : > { %2279 = vmatpush1.bf16.msra.mxu1 %v5881_v15  ;;  %2121 = vmatprep.subr.bf16.mxu0 %v5882_v16  ;;  %v5923_v43 = vld [vmem:[#allocation5 + $0x1e8] ss:$24 sps:$4 sm:$0xff]   ;;  %v5926_v45 = vld [vmem:[#allocation5 + $0x21c] ss:$24 sps:$4 sm:$0xff]   ;;  %v5929_v49 = vld [vmem:[#allocation5 + $0x218] ss:$24 sps:$4 sm:$0xff]  }
  0xc7   : > { %2280 = vmatprep.subr.bf16.mxu1 %v5884_v17  ;;  %v318_v46 = vld [vmem:[%s7193_s26 + $0x8] sm:$0xff]  ;;  %v324_v47 = vld [vmem:[%s7193_s26 + $0x38] sm:$0xff]  ;;  %v317_v4 = vld [vmem:[%s7193_s26] sm:$0xff]  ;;  %s7407_s29 = scalar_lea.vmem [#allocation11], %s5770_s14  ;;  %s4888_s7 = scalar_lea.sflag [#allocation4], %s7187_s27 }
  0xc8   : > { %v5928_v48 = vld [vmem:[#allocation5 + $0x210] ss:$24 sps:$4 sm:$0xff]   ;;  %v7209_v50 = vpack.c.bf16 %v324_v47, %v318_v46  ;;  %v5930_v51 = vld [vmem:[#allocation5 + $0x244] ss:$24 sps:$4 sm:$0xff]   ;;  %v5934_v53 = vld [vmem:[#allocation5 + $0x240] ss:$24 sps:$4 sm:$0xff]  }
  0xc9   : > { %2122 = vmatpush1.bf16.msra.mxu0 %v5886_v18  ;;  %v5932_v52 = vld [vmem:[#allocation5 + $0x24c] ss:$24 sps:$4 sm:$0xff]   ;;  %v5935_v54 = vld [vmem:[#allocation5 + $0x248] ss:$24 sps:$4 sm:$0xff]   ;;  %v5938_v56 = vld [vmem:[#allocation5 + $0x27c] ss:$24 sps:$4 sm:$0xff]  }
  0xca   : > { %2281 = vmatpush1.bf16.msra.mxu1 %v5887_v19  ;;  %2123 = vmatprep.subr.bf16.mxu0 %v5888_v20  ;;  %v5936_v55 = vld [vmem:[#allocation5 + $0x274] ss:$24 sps:$4 sm:$0xff]   ;;  %v5940_v57 = vld [vmem:[#allocation5 + $0x270] ss:$24 sps:$4 sm:$0xff]   ;;  %v5942_v59 = vld [vmem:[#allocation5 + $0x2a4] ss:$24 sps:$4 sm:$0xff]  }
  0xcb   : > { %2282 = vmatprep.subr.bf16.mxu1 %v5890_v21  ;;  %2145 = vmatprep.mubr.bf16.mxu0 %v7209_v50  ;;  %v5941_v58 = vld [vmem:[#allocation5 + $0x278] ss:$24 sps:$4 sm:$0xff]   ;;  %v5944_v60 = vld [vmem:[#allocation5 + $0x2ac] ss:$24 sps:$4 sm:$0xff]   ;;  %v5947_v62 = vld [vmem:[#allocation5 + $0x2a8] ss:$24 sps:$4 sm:$0xff]  }
  0xcc   : > { %2304 = vmatprep.mubr.bf16.mxu1 %v7209_v50  ;;  %v5946_v61 = vld [vmem:[#allocation5 + $0x2a0] ss:$24 sps:$4 sm:$0xff]   ;;  %v5948_v63 = vld [vmem:[#allocation5 + $0x2d4] ss:$24 sps:$4 sm:$0xff]   ;;  %v5952_v1 = vld [vmem:[#allocation5 + $0x2d0] ss:$24 sps:$4 sm:$0xff]  }
  0xcd   : > { %2124 = vmatpush1.bf16.msra.mxu0 %v5892_v22  ;;  %v5950_v0 = vld [vmem:[#allocation5 + $0x2dc] ss:$24 sps:$4 sm:$0xff]   ;;  %v5953_v2 = vld [vmem:[#allocation5 + $0x2d8] ss:$24 sps:$4 sm:$0xff]   ;;  %v5959_v6 = vld [vmem:[#allocation5 + $0x30c] ss:$24 sps:$4 sm:$0xff]  }
  0xce   : > { %2283 = vmatpush1.bf16.msra.mxu1 %v5893_v23  ;;  %2125 = vmatprep.subr.bf16.mxu0 %v5894_v24  ;;  %v5956_v3 = vld [vmem:[#allocation5 + $0x304] ss:$24 sps:$4 sm:$0xff]   ;;  %v323_v5 = vld [vmem:[%s7193_s26 + $0x30] sm:$0xff]  ;;  %v5954_v7 = vld [vmem:[#allocation5 + $0x300] ss:$24 sps:$4 sm:$0xff]   ;;  %p7531_p1 = scmp.ne.s32.totalorder %s7517_s30, 0 }
  0xcf   : > { %2284 = vmatprep.subr.bf16.mxu1 %v5896_v25  ;;  %v5957_v8 = vld [vmem:[#allocation5 + $0x308] ss:$24 sps:$4 sm:$0xff]   ;;  %v7215_v9 = vpack.c.bf16 %v323_v5, %v317_v4  ;;  %v5962_v10 = vld [vmem:[#allocation5 + $0x334] ss:$24 sps:$4 sm:$0xff]   ;;  %v5963_v13 = vld [vmem:[#allocation5 + $0x338] ss:$24 sps:$4 sm:$0xff]  }
  0xd0   : > { %v5965_v11 = vld [vmem:[#allocation5 + $0x33c] ss:$24 sps:$4 sm:$0xff]   ;;  %v5960_v12 = vld [vmem:[#allocation5 + $0x330] ss:$24 sps:$4 sm:$0xff]   ;;  %v5971_v15 = vld [vmem:[#allocation5 + $0x36c] ss:$24 sps:$4 sm:$0xff]  }
  0xd1   : > { %2126 = vmatpush1.bf16.msra.mxu0 %v5898_v26  ;;  %v5968_v14 = vld [vmem:[#allocation5 + $0x364] ss:$24 sps:$4 sm:$0xff]   ;;  %v5966_v16 = vld [vmem:[#allocation5 + $0x360] ss:$24 sps:$4 sm:$0xff]   ;;  %v5974_v18 = vld [vmem:[#allocation5 + $0x394] ss:$24 sps:$4 sm:$0xff]  }
  0xd2   : > { %2285 = vmatpush1.bf16.msra.mxu1 %v5899_v27  ;;  %2127 = vmatprep.subr.bf16.mxu0 %v5900_v28  ;;  %v5969_v17 = vld [vmem:[#allocation5 + $0x368] ss:$24 sps:$4 sm:$0xff]   ;;  %v5977_v19 = vld [vmem:[#allocation5 + $0x39c] ss:$24 sps:$4 sm:$0xff]   ;;  %v5975_v21 = vld [vmem:[#allocation5 + $0x398] ss:$24 sps:$4 sm:$0xff]  }
  0xd3   : > { %2286 = vmatprep.subr.bf16.mxu1 %v5902_v29  ;;  %v5972_v20 = vld [vmem:[#allocation5 + $0x390] ss:$24 sps:$4 sm:$0xff]   ;;  %v5980_v22 = vld [vmem:[#allocation5 + $0x3c4] ss:$24 sps:$4 sm:$0xff]   ;;  %v5978_v24 = vld [vmem:[#allocation5 + $0x3c0] ss:$24 sps:$4 sm:$0xff]  }
  0xd4   : > { %v5983_v23 = vld [vmem:[#allocation5 + $0x3cc] ss:$24 sps:$4 sm:$0xff]   ;;  %v5981_v25 = vld [vmem:[#allocation5 + $0x3c8] ss:$24 sps:$4 sm:$0xff]   ;;  %v5989_v27 = vld [vmem:[#allocation5 + $0x3fc] ss:$24 sps:$4 sm:$0xff]  }
  0xd5   : > { %2128 = vmatpush1.bf16.msra.mxu0 %v5904_v30  ;;  %v5986_v26 = vld [vmem:[#allocation5 + $0x3f4] ss:$24 sps:$4 sm:$0xff]   ;;  %v336_v29 = vld [vmem:[%s7193_s26 + $0x98] sm:$0xff]  ;;  %v5984_v30 = vld [vmem:[#allocation5 + $0x3f0] ss:$24 sps:$4 sm:$0xff]   ;;  %s5615_s10 = sshll.u32 (%p7531_p1), %s7001_s22, 2 }
  0xd6   : > { %2287 = vmatpush1.bf16.msra.mxu1 %v5905_v31  ;;  %2129 = vmatprep.subr.bf16.mxu0 %v5906_v32  ;;  %v330_v28 = vld [vmem:[%s7193_s26 + $0x68] sm:$0xff]  ;;  %v5987_v32 = vld [vmem:[#allocation5 + $0x3f8] ss:$24 sps:$4 sm:$0xff]   ;;  %v6004_v47 = vld [vmem:[#allocation5 + $0x484] ss:$24 sps:$4 sm:$0xff]   ;;  %s4896_s11 = ssub.s32 (%p7531_p1), 5, %s5615_s10 }
  0xd7   : > { %2288 = vmatprep.subr.bf16.mxu1 %v5908_v33  ;;  %v7221_v31 = vpack.c.bf16 %v336_v29, %v330_v28  ;;  %v5992_v33 = vld [vmem:[#allocation5 + $0x424] ss:$24 sps:$4 sm:$0xff]   ;;  %v5999_v46 = vld [vmem:[#allocation5 + $0x458] ss:$24 sps:$4 sm:$0xff]   ;;  %v6034_v4 = vld [vmem:[#allocation5 + $0x574] ss:$24 sps:$4 sm:$0xff]  }
  0xd8   : > { %v6037_v5 = vld [vmem:[#allocation5 + $0x57c] ss:$24 sps:$4 sm:$0xff]   ;;  %v6056_v28 = vld [vmem:[#allocation5 + $0x630] ss:$24 sps:$4 sm:$0xff]   ;;  %p4897_p6 = scmp.lt.s32.totalorder (%p7531_p1), %s4896_s11, 4 }
  0xd9   : > { %2130 = vmatpush1.bf16.msra.mxu0 %v5910_v34  ;;  %v5995_v34 = vld [vmem:[#allocation5 + $0x42c] ss:$24 sps:$4 sm:$0xff]  }
  0xda   : > { %2289 = vmatpush1.bf16.msra.mxu1 %v5911_v35  ;;  %2131 = vmatprep.subr.bf16.mxu0 %v5912_v36  ;;  %v329_v35 = vld [vmem:[%s7193_s26 + $0x60] sm:$0xff]  ;;  %v335_v36 = vld [vmem:[%s7193_s26 + $0x90] sm:$0xff] }
  0xdb   : > { %2290 = vmatprep.subr.bf16.mxu1 %v5914_v37  ;;  %v7227_v37 = vpack.c.bf16 %v335_v36, %v329_v35  ;;  %v6067_v35 = vld [vmem:[#allocation5 + $0x66c] ss:$24 sps:$4 sm:$0xff]   ;;  %v6062_v36 = vld [vmem:[#allocation5 + $0x660] ss:$24 sps:$4 sm:$0xff]  }
  0xdd   : > { %2132 = vmatpush1.bf16.msra.mxu0 %v5916_v38  ;;  %v5990_v38 = vld [vmem:[#allocation5 + $0x420] ss:$24 sps:$4 sm:$0xff]  }
  0xde   : > { %2291 = vmatpush1.bf16.msra.mxu1 %v5917_v39  ;;  %2133 = vmatprep.subr.bf16.mxu0 %v5918_v40  ;;  %v5993_v39 = vld [vmem:[#allocation5 + $0x428] ss:$24 sps:$4 sm:$0xff]   ;;  %v320_v40 = vld [vmem:[%s7193_s26 + $0x18] sm:$0xff] }
  0xdf   : > { %2292 = vmatprep.subr.bf16.mxu1 %v5920_v41  ;;  %v326_v41 = vld [vmem:[%s7193_s26 + $0x48] sm:$0xff] }
  0xe1   : > { %2134 = vmatpush1.bf16.msra.mxu0 %v5922_v42  ;;  %v5998_v42 = vld [vmem:[#allocation5 + $0x454] ss:$24 sps:$4 sm:$0xff]  }
  0xe2   : > { %2293 = vmatpush1.bf16.msra.mxu1 %v5923_v43  ;;  %2135 = vmatprep.subr.bf16.mxu0 %v5924_v44  ;;  %v6001_v43 = vld [vmem:[#allocation5 + $0x45c] ss:$24 sps:$4 sm:$0xff]   ;;  %v7231_v44 = vpack.c.bf16 %v326_v41, %v320_v40  ;;  %v6065_v41 = vld [vmem:[#allocation5 + $0x668] ss:$24 sps:$4 sm:$0xff]  }
  0xe3   : > { %2294 = vmatprep.subr.bf16.mxu1 %v5926_v45  ;;  %v5996_v45 = vld [vmem:[#allocation5 + $0x450] ss:$24 sps:$4 sm:$0xff]   ;;  %v328_v40 = vld [vmem:[%s7193_s26 + $0x58] sm:$0xff] }
  0xe5   : > { %2136 = vmatpush1.bf16.msra.mxu0 %v5928_v48  ;;  %v6007_v48 = vld [vmem:[#allocation5 + $0x48c] ss:$24 sps:$4 sm:$0xff]  }
  0xe6   : > { %2295 = vmatpush1.bf16.msra.mxu1 %v5929_v49  ;;  %2137 = vmatprep.subr.bf16.mxu0 %v5930_v51  ;;  %v6002_v49 = vld [vmem:[#allocation5 + $0x480] ss:$24 sps:$4 sm:$0xff]  }
  0xe7   : > { %2296 = vmatprep.subr.bf16.mxu1 %v5932_v52  ;;  %v6005_v51 = vld [vmem:[#allocation5 + $0x488] ss:$24 sps:$4 sm:$0xff]   ;;  %v6010_v52 = vld [vmem:[#allocation5 + $0x4b4] ss:$24 sps:$4 sm:$0xff]  }
  0xe9   : > { %2138 = vmatpush1.bf16.msra.mxu0 %v5934_v53  ;;  %v6013_v53 = vld [vmem:[#allocation5 + $0x4bc] ss:$24 sps:$4 sm:$0xff]  }
  0xea   : > { %2297 = vmatpush1.bf16.msra.mxu1 %v5935_v54  ;;  %2139 = vmatprep.subr.bf16.mxu0 %v5936_v55  ;;  %v6008_v54 = vld [vmem:[#allocation5 + $0x4b0] ss:$24 sps:$4 sm:$0xff]  }
  0xeb   : > { %2298 = vmatprep.subr.bf16.mxu1 %v5938_v56  ;;  %v6011_v55 = vld [vmem:[#allocation5 + $0x4b8] ss:$24 sps:$4 sm:$0xff]   ;;  %v6016_v56 = vld [vmem:[#allocation5 + $0x4e4] ss:$24 sps:$4 sm:$0xff]  }
  0xed   : > { %2140 = vmatpush1.bf16.msra.mxu0 %v5940_v57  ;;  %v6019_v57 = vld [vmem:[#allocation5 + $0x4ec] ss:$24 sps:$4 sm:$0xff]  }
  0xee   : > { %2299 = vmatpush1.bf16.msra.mxu1 %v5941_v58  ;;  %2141 = vmatprep.subr.bf16.mxu0 %v5942_v59  ;;  %v6014_v58 = vld [vmem:[#allocation5 + $0x4e0] ss:$24 sps:$4 sm:$0xff]  }
  0xef   : > { %2300 = vmatprep.subr.bf16.mxu1 %v5944_v60  ;;  %v6017_v59 = vld [vmem:[#allocation5 + $0x4e8] ss:$24 sps:$4 sm:$0xff]   ;;  %v6022_v60 = vld [vmem:[#allocation5 + $0x514] ss:$24 sps:$4 sm:$0xff]  }
  0xf1   : > { %2142 = vmatpush1.bf16.msra.mxu0 %v5946_v61  ;;  %v6025_v61 = vld [vmem:[#allocation5 + $0x51c] ss:$24 sps:$4 sm:$0xff]  }
  0xf2   : > { %2301 = vmatpush1.bf16.msra.mxu1 %v5947_v62  ;;  %2143 = vmatprep.subr.bf16.mxu0 %v5948_v63  ;;  %v6020_v62 = vld [vmem:[#allocation5 + $0x510] ss:$24 sps:$4 sm:$0xff]  }
  0xf3   : > { %2302 = vmatprep.subr.bf16.mxu1 %v5950_v0  ;;  %v6023_v63 = vld [vmem:[#allocation5 + $0x518] ss:$24 sps:$4 sm:$0xff]   ;;  %v6028_v0 = vld [vmem:[#allocation5 + $0x544] ss:$24 sps:$4 sm:$0xff]  }
  0xf5   : > { %2144 = vmatpush1.bf16.msra.mxu0 %v5952_v1  ;;  %v6031_v1 = vld [vmem:[#allocation5 + $0x54c] ss:$24 sps:$4 sm:$0xff]  }
  0xf6   : > { %2303 = vmatpush1.bf16.msra.mxu1 %v5953_v2  ;;  %2166 = vmatprep.subr.bf16.mxu0 %v5956_v3  ;;  %v6026_v2 = vld [vmem:[#allocation5 + $0x540] ss:$24 sps:$4 sm:$0xff]  }
  0xf7   : > { %2325 = vmatprep.subr.bf16.mxu1 %v5959_v6  ;;  %v6029_v3 = vld [vmem:[#allocation5 + $0x548] ss:$24 sps:$4 sm:$0xff]  }
  0xf8   : > { %2146 = vmatmul.mubr.bf16.vlgmr.msra.gmra.mrb[0].mxu0 %v7215_v9  ;;  %v6032_v6 = vld [vmem:[#allocation5 + $0x570] ss:$24 sps:$4 sm:$0xff]  }
  0xf9   : > { %2305 = vmatmul.mubr.bf16.vlgmr.msra.gmra.mrb[0].mxu1 %v7215_v9  ;;  %2167 = vmatpush1.bf16.msra.mxu0 %v5954_v7  ;;  %v6035_v7 = vld [vmem:[#allocation5 + $0x578] ss:$24 sps:$4 sm:$0xff]  }
  0xfa   : > { %2326 = vmatpush1.bf16.msra.mxu1 %v5957_v8  ;;  %2168 = vmatprep.subr.bf16.mxu0 %v5962_v10  ;;  %v6040_v8 = vld [vmem:[#allocation5 + $0x5a4] ss:$24 sps:$4 sm:$0xff]  }
  0xfb   : > { %2327 = vmatprep.subr.bf16.mxu1 %v5965_v11  ;;  %2155 = vmatprep.mubr.bf16.mxu0 %v7221_v31  ;;  %v6043_v10 = vld [vmem:[#allocation5 + $0x5ac] ss:$24 sps:$4 sm:$0xff]   ;;  %v6038_v11 = vld [vmem:[#allocation5 + $0x5a0] ss:$24 sps:$4 sm:$0xff]  }
  0xfc   : > { %2314 = vmatprep.mubr.bf16.mxu1 %v7221_v31 }
  0xfd   : > { %2169 = vmatpush1.bf16.msra.mxu0 %v5960_v12  ;;  %v6041_v12 = vld [vmem:[#allocation5 + $0x5a8] ss:$24 sps:$4 sm:$0xff]  }
  0xfe   : > { %2328 = vmatpush1.bf16.msra.mxu1 %v5963_v13  ;;  %2170 = vmatprep.subr.bf16.mxu0 %v5968_v14  ;;  %v6046_v13 = vld [vmem:[#allocation5 + $0x5d4] ss:$24 sps:$4 sm:$0xff]  }
  0xff   : > { %2329 = vmatprep.subr.bf16.mxu1 %v5971_v15  ;;  %v6049_v14 = vld [vmem:[#allocation5 + $0x5dc] ss:$24 sps:$4 sm:$0xff]   ;;  %v6044_v15 = vld [vmem:[#allocation5 + $0x5d0] ss:$24 sps:$4 sm:$0xff]  }
 0x100   : > { %2156 = vmatmul.mubr.bf16.gmra.mrb[4].mxu0 %v7227_v37 }
 0x101   : > { %2171 = vmatpush1.bf16.msra.mxu0 %v5966_v16  ;;  %2315 = vmatmul.mubr.bf16.gmra.mrb[4].mxu1 %v7227_v37  ;;  %v6047_v16 = vld [vmem:[#allocation5 + $0x5d8] ss:$24 sps:$4 sm:$0xff]  }
 0x102   : > { %2330 = vmatpush1.bf16.msra.mxu1 %v5969_v17  ;;  %2172 = vmatprep.subr.bf16.mxu0 %v5974_v18  ;;  %v6052_v17 = vld [vmem:[#allocation5 + $0x604] ss:$24 sps:$4 sm:$0xff]   ;;  %v319_v18 = vld [vmem:[%s7193_s26 + $0x10] sm:$0xff] }
 0x103   : > { %2331 = vmatprep.subr.bf16.mxu1 %v5977_v19  ;;  %2198 = vmatprep.mubr.bf16.mxu0 %v7231_v44  ;;  %v325_v19 = vld [vmem:[%s7193_s26 + $0x40] sm:$0xff] }
 0x104   : > { %2357 = vmatprep.mubr.bf16.mxu1 %v7231_v44 }
 0x105   : > { %2173 = vmatpush1.bf16.msra.mxu0 %v5972_v20  ;;  %v6055_v20 = vld [vmem:[#allocation5 + $0x60c] ss:$24 sps:$4 sm:$0xff]  }
 0x106   : > { %2332 = vmatpush1.bf16.msra.mxu1 %v5975_v21  ;;  %2174 = vmatprep.subr.bf16.mxu0 %v5980_v22  ;;  %v6050_v21 = vld [vmem:[#allocation5 + $0x600] ss:$24 sps:$4 sm:$0xff]  }
 0x107   : > { %2333 = vmatprep.subr.bf16.mxu1 %v5983_v23  ;;  %v6053_v22 = vld [vmem:[#allocation5 + $0x608] ss:$24 sps:$4 sm:$0xff]   ;;  %v7239_v23 = vpack.c.bf16 %v325_v19, %v319_v18  ;;  %v6124_v18 = vld [vmem:[#allocation5 + $0x844] ss:$24 sps:$4 sm:$0xff]  }
 0x108   : > { %v6127_v19 = vld [vmem:[#allocation5 + $0x84c] ss:$24 sps:$4 sm:$0xff]  }
 0x109   : > { %2175 = vmatpush1.bf16.msra.mxu0 %v5978_v24  ;;  %v332_v24 = vld [vmem:[%s7193_s26 + $0x78] sm:$0xff] }
 0x10a   : > { %2334 = vmatpush1.bf16.msra.mxu1 %v5981_v25  ;;  %2176 = vmatprep.subr.bf16.mxu0 %v5986_v26  ;;  %v338_v25 = vld [vmem:[%s7193_s26 + $0xa8] sm:$0xff] }
 0x10b   : > { %2335 = vmatprep.subr.bf16.mxu1 %v5989_v27  ;;  %v6058_v26 = vld [vmem:[#allocation5 + $0x634] ss:$24 sps:$4 sm:$0xff]   ;;  %v7243_v29 = vpack.c.bf16 %v338_v25, %v332_v24  ;;  %v6128_v25 = vld [vmem:[#allocation5 + $0x870] ss:$24 sps:$4 sm:$0xff]  }
 0x10c   : > { %v6061_v27 = vld [vmem:[#allocation5 + $0x63c] ss:$24 sps:$4 sm:$0xff]  }
 0x10d   : > { %2177 = vmatpush1.bf16.msra.mxu0 %v5984_v30  ;;  %v6059_v30 = vld [vmem:[#allocation5 + $0x638] ss:$24 sps:$4 sm:$0xff]   ;;  %v6133_v24 = vld [vmem:[#allocation5 + $0x87c] ss:$24 sps:$4 sm:$0xff]  }
 0x10e   : > { %2336 = vmatpush1.bf16.msra.mxu1 %v5987_v32  ;;  %2178 = vmatprep.subr.bf16.mxu0 %v5992_v33  ;;  %v331_v32 = vld [vmem:[%s7193_s26 + $0x70] sm:$0xff]  ;;  %v337_v33 = vld [vmem:[%s7193_s26 + $0xa0] sm:$0xff] }
 0x10f   : > { %2337 = vmatprep.subr.bf16.mxu1 %v5995_v34  ;;  %v6064_v34 = vld [vmem:[#allocation5 + $0x664] ss:$24 sps:$4 sm:$0xff]  }
 0x111   : > { %2179 = vmatpush1.bf16.msra.mxu0 %v5990_v38  ;;  %v7251_v38 = vpack.c.bf16 %v337_v33, %v331_v32  ;;  %v6137_v32 = vld [vmem:[#allocation5 + $0x8a8] ss:$24 sps:$4 sm:$0xff]   ;;  %v6142_v33 = vld [vmem:[#allocation5 + $0x8d4] ss:$24 sps:$4 sm:$0xff]  }
 0x112   : > { %2338 = vmatpush1.bf16.msra.mxu1 %v5993_v39  ;;  %2180 = vmatprep.subr.bf16.mxu0 %v5998_v42  ;;  %v322_v39 = vld [vmem:[%s7193_s26 + $0x28] sm:$0xff] }
 0x113   : > { %2339 = vmatprep.subr.bf16.mxu1 %v6001_v43  ;;  %v6070_v42 = vld [vmem:[#allocation5 + $0x694] ss:$24 sps:$4 sm:$0xff]  }
 0x114   : > { %v6073_v43 = vld [vmem:[#allocation5 + $0x69c] ss:$24 sps:$4 sm:$0xff]  }
 0x115   : > { %2181 = vmatpush1.bf16.msra.mxu0 %v5996_v45  ;;  %v7255_v45 = vpack.c.bf16 %v328_v40, %v322_v39  ;;  %v321_v39 = vld [vmem:[%s7193_s26 + $0x20] sm:$0xff]  ;;  %v327_v40 = vld [vmem:[%s7193_s26 + $0x50] sm:$0xff] }
 0x116   : > { %2340 = vmatpush1.bf16.msra.mxu1 %v5999_v46  ;;  %2182 = vmatprep.subr.bf16.mxu0 %v6004_v47  ;;  %v6068_v46 = vld [vmem:[#allocation5 + $0x690] ss:$24 sps:$4 sm:$0xff]  }
 0x117   : > { %2341 = vmatprep.subr.bf16.mxu1 %v6007_v48  ;;  %v6071_v47 = vld [vmem:[#allocation5 + $0x698] ss:$24 sps:$4 sm:$0xff]   ;;  %v6076_v48 = vld [vmem:[#allocation5 + $0x6c4] ss:$24 sps:$4 sm:$0xff]  }
 0x119   : > { %2183 = vmatpush1.bf16.msra.mxu0 %v6002_v49  ;;  %v6079_v49 = vld [vmem:[#allocation5 + $0x6cc] ss:$24 sps:$4 sm:$0xff]  }
 0x11a   : > { %2342 = vmatpush1.bf16.msra.mxu1 %v6005_v51  ;;  %2184 = vmatprep.subr.bf16.mxu0 %v6010_v52  ;;  %v6074_v51 = vld [vmem:[#allocation5 + $0x6c0] ss:$24 sps:$4 sm:$0xff]  }
 0x11b   : > { %2343 = vmatprep.subr.bf16.mxu1 %v6013_v53  ;;  %v6077_v52 = vld [vmem:[#allocation5 + $0x6c8] ss:$24 sps:$4 sm:$0xff]   ;;  %v6082_v53 = vld [vmem:[#allocation5 + $0x6f4] ss:$24 sps:$4 sm:$0xff]  }
 0x11d   : > { %2185 = vmatpush1.bf16.msra.mxu0 %v6008_v54  ;;  %v6085_v54 = vld [vmem:[#allocation5 + $0x6fc] ss:$24 sps:$4 sm:$0xff]  }
 0x11e   : > { %2344 = vmatpush1.bf16.msra.mxu1 %v6011_v55  ;;  %2186 = vmatprep.subr.bf16.mxu0 %v6016_v56  ;;  %v6080_v55 = vld [vmem:[#allocation5 + $0x6f0] ss:$24 sps:$4 sm:$0xff]  }
 0x11f   : > { %2345 = vmatprep.subr.bf16.mxu1 %v6019_v57  ;;  %v6083_v56 = vld [vmem:[#allocation5 + $0x6f8] ss:$24 sps:$4 sm:$0xff]   ;;  %v6088_v57 = vld [vmem:[#allocation5 + $0x724] ss:$24 sps:$4 sm:$0xff]  }
 0x121   : > { %2187 = vmatpush1.bf16.msra.mxu0 %v6014_v58  ;;  %v6091_v58 = vld [vmem:[#allocation5 + $0x72c] ss:$24 sps:$4 sm:$0xff]  }
 0x122   : > { %2346 = vmatpush1.bf16.msra.mxu1 %v6017_v59  ;;  %2188 = vmatprep.subr.bf16.mxu0 %v6022_v60  ;;  %v6086_v59 = vld [vmem:[#allocation5 + $0x720] ss:$24 sps:$4 sm:$0xff]  }
 0x123   : > { %2347 = vmatprep.subr.bf16.mxu1 %v6025_v61  ;;  %v6089_v60 = vld [vmem:[#allocation5 + $0x728] ss:$24 sps:$4 sm:$0xff]   ;;  %v6094_v61 = vld [vmem:[#allocation5 + $0x754] ss:$24 sps:$4 sm:$0xff]  }
 0x125   : > { %2189 = vmatpush1.bf16.msra.mxu0 %v6020_v62  ;;  %v6097_v62 = vld [vmem:[#allocation5 + $0x75c] ss:$24 sps:$4 sm:$0xff]  }
 0x126   : > { %2348 = vmatpush1.bf16.msra.mxu1 %v6023_v63  ;;  %2190 = vmatprep.subr.bf16.mxu0 %v6028_v0  ;;  %v6092_v63 = vld [vmem:[#allocation5 + $0x750] ss:$24 sps:$4 sm:$0xff]  }
 0x127   : > { %2349 = vmatprep.subr.bf16.mxu1 %v6031_v1  ;;  %v6095_v0 = vld [vmem:[#allocation5 + $0x758] ss:$24 sps:$4 sm:$0xff]   ;;  %v6100_v1 = vld [vmem:[#allocation5 + $0x784] ss:$24 sps:$4 sm:$0xff]  }
 0x129   : > { %2191 = vmatpush1.bf16.msra.mxu0 %v6026_v2  ;;  %v6103_v2 = vld [vmem:[#allocation5 + $0x78c] ss:$24 sps:$4 sm:$0xff]  }
 0x12a   : > { %2350 = vmatpush1.bf16.msra.mxu1 %v6029_v3  ;;  %2192 = vmatprep.subr.bf16.mxu0 %v6034_v4  ;;  %v6098_v3 = vld [vmem:[#allocation5 + $0x780] ss:$24 sps:$4 sm:$0xff]  }
 0x12b   : > { %2351 = vmatprep.subr.bf16.mxu1 %v6037_v5  ;;  %v6101_v4 = vld [vmem:[#allocation5 + $0x788] ss:$24 sps:$4 sm:$0xff]   ;;  %v6106_v5 = vld [vmem:[#allocation5 + $0x7b4] ss:$24 sps:$4 sm:$0xff]  }
 0x12d   : > { %2193 = vmatpush1.bf16.msra.mxu0 %v6032_v6  ;;  %v6109_v6 = vld [vmem:[#allocation5 + $0x7bc] ss:$24 sps:$4 sm:$0xff]  }
 0x12e   : > { %2352 = vmatpush1.bf16.msra.mxu1 %v6035_v7  ;;  %2194 = vmatprep.subr.bf16.mxu0 %v6040_v8  ;;  %v6104_v7 = vld [vmem:[#allocation5 + $0x7b0] ss:$24 sps:$4 sm:$0xff]  }
 0x12f   : > { %2353 = vmatprep.subr.bf16.mxu1 %v6043_v10  ;;  %v6107_v8 = vld [vmem:[#allocation5 + $0x7b8] ss:$24 sps:$4 sm:$0xff]   ;;  %v6112_v10 = vld [vmem:[#allocation5 + $0x7e4] ss:$24 sps:$4 sm:$0xff]  }
 0x131   : > { %2195 = vmatpush1.bf16.msra.mxu0 %v6038_v11  ;;  %v6115_v11 = vld [vmem:[#allocation5 + $0x7ec] ss:$24 sps:$4 sm:$0xff]  }
 0x132   : > { %2354 = vmatpush1.bf16.msra.mxu1 %v6041_v12  ;;  %2196 = vmatprep.subr.bf16.mxu0 %v6046_v13  ;;  %v6110_v12 = vld [vmem:[#allocation5 + $0x7e0] ss:$24 sps:$4 sm:$0xff]  }
 0x133   : > { %2355 = vmatprep.subr.bf16.mxu1 %v6049_v14  ;;  %v6113_v13 = vld [vmem:[#allocation5 + $0x7e8] ss:$24 sps:$4 sm:$0xff]   ;;  %v6118_v14 = vld [vmem:[#allocation5 + $0x814] ss:$24 sps:$4 sm:$0xff]  }
 0x135   : > { %2197 = vmatpush1.bf16.msra.mxu0 %v6044_v15  ;;  %v6121_v15 = vld [vmem:[#allocation5 + $0x81c] ss:$24 sps:$4 sm:$0xff]  }
 0x136   : > { %2356 = vmatpush1.bf16.msra.mxu1 %v6047_v16  ;;  %2219 = vmatprep.subr.bf16.mxu0 %v6052_v17  ;;  %v6116_v16 = vld [vmem:[#allocation5 + $0x810] ss:$24 sps:$4 sm:$0xff]  }
 0x137   : > { %2378 = vmatprep.subr.bf16.mxu1 %v6055_v20  ;;  %v6119_v17 = vld [vmem:[#allocation5 + $0x818] ss:$24 sps:$4 sm:$0xff]  }
 0x138   : > { %2199 = vmatmul.mubr.bf16.vlgmr.msra.gmra.mrb[0].mxu0 %v7239_v23  ;;  %v6122_v20 = vld [vmem:[#allocation5 + $0x840] ss:$24 sps:$4 sm:$0xff]  }
 0x139   : > { %2358 = vmatmul.mubr.bf16.vlgmr.msra.gmra.mrb[0].mxu1 %v7239_v23  ;;  %2220 = vmatpush1.bf16.msra.mxu0 %v6050_v21  ;;  %v6125_v21 = vld [vmem:[#allocation5 + $0x848] ss:$24 sps:$4 sm:$0xff]  }
 0x13a   : > { %2379 = vmatpush1.bf16.msra.mxu1 %v6053_v22  ;;  %2221 = vmatprep.subr.bf16.mxu0 %v6058_v26  ;;  %v6130_v22 = vld [vmem:[#allocation5 + $0x874] ss:$24 sps:$4 sm:$0xff]   ;;  %v6131_v26 = vld [vmem:[#allocation5 + $0x878] ss:$24 sps:$4 sm:$0xff]  }
 0x13b   : > { %2380 = vmatprep.subr.bf16.mxu1 %v6061_v27  ;;  %2208 = vmatprep.mubr.bf16.mxu0 %v7243_v29  ;;  %v6136_v27 = vld [vmem:[#allocation5 + $0x8a4] ss:$24 sps:$4 sm:$0xff]  }
 0x13c   : > { %2367 = vmatprep.mubr.bf16.mxu1 %v7243_v29 }
 0x13d   : > { %2222 = vmatpush1.bf16.msra.mxu0 %v6056_v28  ;;  %v6139_v28 = vld [vmem:[#allocation5 + $0x8ac] ss:$24 sps:$4 sm:$0xff]  }
 0x13e   : > { %2381 = vmatpush1.bf16.msra.mxu1 %v6059_v30  ;;  %2223 = vmatprep.subr.bf16.mxu0 %v6064_v34  ;;  %v6134_v30 = vld [vmem:[#allocation5 + $0x8a0] ss:$24 sps:$4 sm:$0xff]   ;;  %v6145_v34 = vld [vmem:[#allocation5 + $0x8dc] ss:$24 sps:$4 sm:$0xff]  }
 0x13f   : > { %2382 = vmatprep.subr.bf16.mxu1 %v6067_v35  ;;  %v6140_v35 = vld [vmem:[#allocation5 + $0x8d0] ss:$24 sps:$4 sm:$0xff]  }
 0x140   : > { %2209 = vmatmul.mubr.bf16.gmra.mrb[4].mxu0 %v7251_v38 }
 0x141   : > { %2368 = vmatmul.mubr.bf16.gmra.mrb[4].mxu1 %v7251_v38  ;;  %2224 = vmatpush1.bf16.msra.mxu0 %v6062_v36  ;;  %v6143_v36 = vld [vmem:[#allocation5 + $0x8d8] ss:$24 sps:$4 sm:$0xff]  }
 0x142   : > { %2383 = vmatpush1.bf16.msra.mxu1 %v6065_v41  ;;  %2225 = vmatprep.subr.bf16.mxu0 %v6070_v42  ;;  %v6148_v41 = vld [vmem:[#allocation5 + $0x14] ss:$24 sps:$4 sm:$0xff]  }
 0x143   : > { %2384 = vmatprep.subr.bf16.mxu1 %v6073_v43  ;;  %2251 = vmatprep.mubr.bf16.mxu0 %v7255_v45  ;;  %v334_v42 = vld [vmem:[%s7193_s26 + $0x88] sm:$0xff]  ;;  %v340_v43 = vld [vmem:[%s7193_s26 + $0xb8] sm:$0xff] }
 0x144   : > { %2410 = vmatprep.mubr.bf16.mxu1 %v7255_v45 }
 0x145   : > { %2226 = vmatpush1.bf16.msra.mxu0 %v6068_v46  ;;  %v7265_v46 = vpack.c.bf16 %v327_v40, %v321_v39  ;;  %v6191_v39 = vld [vmem:[#allocation5 + $0x2e0] ss:$24 sps:$4 sm:$0xff]   ;;  %v6196_v40 = vld [vmem:[#allocation5 + $0x314] ss:$24 sps:$4 sm:$0xff]  }
 0x146   : > { %2385 = vmatpush1.bf16.msra.mxu1 %v6071_v47  ;;  %2227 = vmatprep.subr.bf16.mxu0 %v6076_v48  ;;  %v6146_v47 = vld [vmem:[#allocation5 + $0x10] ss:$24 sps:$4 sm:$0xff]   ;;  %v6151_v48 = vld [vmem:[#allocation5 + $0x44] ss:$24 sps:$4 sm:$0xff]  }
 0x147   : > { %2386 = vmatprep.subr.bf16.mxu1 %v6079_v49  ;;  %v7267_v49 = vpack.c.bf16 %v340_v43, %v334_v42  ;;  %v6316_v42 = vld [vmem:[#allocation8 + $0x184] ss:$24 sps:$4 sm:$0xff]   ;;  %v6314_v43 = vld [vmem:[#allocation8 + $0x180] ss:$24 sps:$4 sm:$0xff]  }
 0x149   : > { %2228 = vmatpush1.bf16.msra.mxu0 %v6074_v51  ;;  %v6149_v51 = vld [vmem:[#allocation5 + $0x40] ss:$24 sps:$4 sm:$0xff]  }
 0x14a   : > { %2387 = vmatpush1.bf16.msra.mxu1 %v6077_v52  ;;  %2229 = vmatprep.subr.bf16.mxu0 %v6082_v53  ;;  %v333_v52 = vld [vmem:[%s7193_s26 + $0x80] sm:$0xff]  ;;  %v339_v53 = vld [vmem:[%s7193_s26 + $0xb0] sm:$0xff] }
 0x14b   : > { %2388 = vmatprep.subr.bf16.mxu1 %v6085_v54  ;;  %v6154_v54 = vld [vmem:[#allocation5 + $0x74] ss:$24 sps:$4 sm:$0xff]  }
 0x14d   : > { %2230 = vmatpush1.bf16.msra.mxu0 %v6080_v55  ;;  %v7275_v55 = vpack.c.bf16 %v339_v53, %v333_v52  ;;  %v6197_v52 = vld [vmem:[#allocation5 + $0x340] ss:$24 sps:$4 sm:$0xff]   ;;  %v6202_v53 = vld [vmem:[#allocation5 + $0x374] ss:$24 sps:$4 sm:$0xff]  }
 0x14e   : > { %2389 = vmatpush1.bf16.msra.mxu1 %v6083_v56  ;;  %2231 = vmatprep.subr.bf16.mxu0 %v6088_v57  ;;  %v6152_v56 = vld [vmem:[#allocation5 + $0x70] ss:$24 sps:$4 sm:$0xff]   ;;  %v6157_v57 = vld [vmem:[#allocation5 + $0xa4] ss:$24 sps:$4 sm:$0xff]  }
 0x14f   : > { %2390 = vmatprep.subr.bf16.mxu1 %v6091_v58  ;;  %v6155_v58 = vld [vmem:[#allocation5 + $0xa0] ss:$24 sps:$4 sm:$0xff]  }
 0x151   : > { %2232 = vmatpush1.bf16.msra.mxu0 %v6086_v59  ;;  %v6160_v59 = vld [vmem:[#allocation5 + $0xd4] ss:$24 sps:$4 sm:$0xff]  }
 0x152   : > { %2391 = vmatpush1.bf16.msra.mxu1 %v6089_v60  ;;  %2233 = vmatprep.subr.bf16.mxu0 %v6094_v61  ;;  %v6158_v60 = vld [vmem:[#allocation5 + $0xd0] ss:$24 sps:$4 sm:$0xff]   ;;  %v6163_v61 = vld [vmem:[#allocation5 + $0x104] ss:$24 sps:$4 sm:$0xff]  }
 0x153   : > { %2392 = vmatprep.subr.bf16.mxu1 %v6097_v62  ;;  %v6161_v62 = vld [vmem:[#allocation5 + $0x100] ss:$24 sps:$4 sm:$0xff]  }
 0x155   : > { %2234 = vmatpush1.bf16.msra.mxu0 %v6092_v63  ;;  %v6166_v63 = vld [vmem:[#allocation5 + $0x134] ss:$24 sps:$4 sm:$0xff]  }
 0x156   : > { %2393 = vmatpush1.bf16.msra.mxu1 %v6095_v0  ;;  %2235 = vmatprep.subr.bf16.mxu0 %v6100_v1  ;;  %v6164_v0 = vld [vmem:[#allocation5 + $0x130] ss:$24 sps:$4 sm:$0xff]   ;;  %v6169_v1 = vld [vmem:[#allocation5 + $0x164] ss:$24 sps:$4 sm:$0xff]  }
 0x157   : > { %2394 = vmatprep.subr.bf16.mxu1 %v6103_v2  ;;  %v6167_v2 = vld [vmem:[#allocation5 + $0x160] ss:$24 sps:$4 sm:$0xff]  }
 0x159   : > { %2236 = vmatpush1.bf16.msra.mxu0 %v6098_v3  ;;  %v6172_v3 = vld [vmem:[#allocation5 + $0x194] ss:$24 sps:$4 sm:$0xff]  }
 0x15a   : > { %2395 = vmatpush1.bf16.msra.mxu1 %v6101_v4  ;;  %2237 = vmatprep.subr.bf16.mxu0 %v6106_v5  ;;  %v6268_v4 = vld [vmem:[#allocation8 + $0x4] ss:$24 sps:$4 sm:$0xff]   ;;  %v6266_v5 = vld [vmem:[#allocation8] ss:$24 sps:$4 sm:$0xff]  }
 0x15b   : > { %2396 = vmatprep.subr.bf16.mxu1 %v6109_v6  ;;  %v6175_v6 = vld [vmem:[#allocation5 + $0x1c4] ss:$24 sps:$4 sm:$0xff]  }
 0x15d   : > { %2238 = vmatpush1.bf16.msra.mxu0 %v6104_v7  ;;  %v6274_v7 = vld [vmem:[#allocation8 + $0x34] ss:$24 sps:$4 sm:$0xff]  }
 0x15e   : > { %2397 = vmatpush1.bf16.msra.mxu1 %v6107_v8  ;;  %2239 = vmatprep.subr.bf16.mxu0 %v6112_v10  ;;  %v6272_v8 = vld [vmem:[#allocation8 + $0x30] ss:$24 sps:$4 sm:$0xff]  }
 0x15f   : > { %2398 = vmatprep.subr.bf16.mxu1 %v6115_v11  ;;  %v6173_v10 = vld [vmem:[#allocation5 + $0x1c0] ss:$24 sps:$4 sm:$0xff]   ;;  %v6178_v11 = vld [vmem:[#allocation5 + $0x1f4] ss:$24 sps:$4 sm:$0xff]  }
 0x161   : > { %2240 = vmatpush1.bf16.msra.mxu0 %v6110_v12  ;;  %v6280_v12 = vld [vmem:[#allocation8 + $0x64] ss:$24 sps:$4 sm:$0xff]  }
 0x162   : > { %2399 = vmatpush1.bf16.msra.mxu1 %v6113_v13  ;;  %2241 = vmatprep.subr.bf16.mxu0 %v6118_v14  ;;  %v6278_v13 = vld [vmem:[#allocation8 + $0x60] ss:$24 sps:$4 sm:$0xff]  }
 0x163   : > { %2400 = vmatprep.subr.bf16.mxu1 %v6121_v15  ;;  %v6176_v14 = vld [vmem:[#allocation5 + $0x1f0] ss:$24 sps:$4 sm:$0xff]   ;;  %v6181_v15 = vld [vmem:[#allocation5 + $0x224] ss:$24 sps:$4 sm:$0xff]  }
 0x165   : > { %2242 = vmatpush1.bf16.msra.mxu0 %v6116_v16  ;;  %v6286_v16 = vld [vmem:[#allocation8 + $0x94] ss:$24 sps:$4 sm:$0xff]  }
 0x166   : > { %2401 = vmatpush1.bf16.msra.mxu1 %v6119_v17  ;;  %2243 = vmatprep.subr.bf16.mxu0 %v6124_v18  ;;  %v6284_v17 = vld [vmem:[#allocation8 + $0x90] ss:$24 sps:$4 sm:$0xff]  }
 0x167   : > { %2402 = vmatprep.subr.bf16.mxu1 %v6127_v19  ;;  %v6179_v18 = vld [vmem:[#allocation5 + $0x220] ss:$24 sps:$4 sm:$0xff]   ;;  %v6184_v19 = vld [vmem:[#allocation5 + $0x254] ss:$24 sps:$4 sm:$0xff]  }
 0x169   : > { %2244 = vmatpush1.bf16.msra.mxu0 %v6122_v20  ;;  %v6292_v20 = vld [vmem:[#allocation8 + $0xc4] ss:$24 sps:$4 sm:$0xff]  }
 0x16a   : > { %2403 = vmatpush1.bf16.msra.mxu1 %v6125_v21  ;;  %2245 = vmatprep.subr.bf16.mxu0 %v6130_v22  ;;  %v6290_v21 = vld [vmem:[#allocation8 + $0xc0] ss:$24 sps:$4 sm:$0xff]  }
 0x16b   : > { %2404 = vmatprep.subr.bf16.mxu1 %v6133_v24  ;;  %v6182_v22 = vld [vmem:[#allocation5 + $0x250] ss:$24 sps:$4 sm:$0xff]   ;;  %v6187_v24 = vld [vmem:[#allocation5 + $0x284] ss:$24 sps:$4 sm:$0xff]  }
 0x16d   : > { %2246 = vmatpush1.bf16.msra.mxu0 %v6128_v25  ;;  %v6298_v25 = vld [vmem:[#allocation8 + $0xf4] ss:$24 sps:$4 sm:$0xff]  }
 0x16e   : > { %2405 = vmatpush1.bf16.msra.mxu1 %v6131_v26  ;;  %2247 = vmatprep.subr.bf16.mxu0 %v6136_v27  ;;  %v6296_v26 = vld [vmem:[#allocation8 + $0xf0] ss:$24 sps:$4 sm:$0xff]  }
 0x16f   : > { %2406 = vmatprep.subr.bf16.mxu1 %v6139_v28  ;;  %v6185_v27 = vld [vmem:[#allocation5 + $0x280] ss:$24 sps:$4 sm:$0xff]   ;;  %v6190_v28 = vld [vmem:[#allocation5 + $0x2b4] ss:$24 sps:$4 sm:$0xff]  }
 0x171   : > { %2248 = vmatpush1.bf16.msra.mxu0 %v6134_v30  ;;  %v6304_v30 = vld [vmem:[#allocation8 + $0x124] ss:$24 sps:$4 sm:$0xff]  }
 0x172   : > { %2407 = vmatpush1.bf16.msra.mxu1 %v6137_v32  ;;  %2249 = vmatprep.subr.bf16.mxu0 %v6142_v33  ;;  %v6302_v32 = vld [vmem:[#allocation8 + $0x120] ss:$24 sps:$4 sm:$0xff]  }
 0x173   : > { %2408 = vmatprep.subr.bf16.mxu1 %v6145_v34  ;;  %v6188_v33 = vld [vmem:[#allocation5 + $0x2b0] ss:$24 sps:$4 sm:$0xff]   ;;  %v6193_v34 = vld [vmem:[#allocation5 + $0x2e4] ss:$24 sps:$4 sm:$0xff]  }
 0x175   : > { %2250 = vmatpush1.bf16.msra.mxu0 %v6140_v35  ;;  %v6310_v35 = vld [vmem:[#allocation8 + $0x154] ss:$24 sps:$4 sm:$0xff]  }
 0x176   : > { %2409 = vmatpush1.bf16.msra.mxu1 %v6143_v36  ;;  %2431 = vmatprep.subr.bf16.mxu0 %v6148_v41  ;;  %v6308_v36 = vld [vmem:[#allocation8 + $0x150] ss:$24 sps:$4 sm:$0xff]  }
 0x177   : > { %4386 = vmatprep.subr.bf16.mxu1 %v6268_v4  ;;  %v6194_v41 = vld [vmem:[#allocation5 + $0x310] ss:$24 sps:$4 sm:$0xff]  }
 0x178   : > { %2252 = vmatmul.mubr.bf16.vlgmr.msra.gmra.mrb[0].mxu0 %v7265_v46  ;;  %v6212_v4 = vld [vmem:[#allocation5 + $0x430] ss:$24 sps:$4 sm:$0xff]  }
 0x179   : > { %2411 = vmatmul.mubr.bf16.vlgmr.msra.gmra.mrb[0].mxu1 %v7265_v46  ;;  %2432 = vmatpush1.bf16.msra.mxu0 %v6146_v47  ;;  %v6199_v47 = vld [vmem:[#allocation5 + $0x344] ss:$24 sps:$4 sm:$0xff]  }
 0x17a   : > { %2261 = vmatprep.mubr.bf16.mxu0 %v7267_v49  ;;  %2433 = vmatprep.subr.bf16.mxu0 %v6151_v48  ;;  %v6322_v48 = vld [vmem:[#allocation8 + $0x1b4] ss:$24 sps:$4 sm:$0xff]  }
 0x17b   : > { %2420 = vmatprep.mubr.bf16.mxu1 %v7267_v49  ;;  %4387 = vmatpush1.bf16.msra.mxu1 %v6266_v5  ;;  %v6350_v5 = vld [vmem:[#allocation8 + $0x2a0] ss:$24 sps:$4 sm:$0xff]  }
 0x17c   : > { %4388 = vmatprep.subr.bf16.mxu1 %v6274_v7  ;;  %v6358_v7 = vld [vmem:[#allocation8 + $0x2d4] ss:$24 sps:$4 sm:$0xff]  }
 0x17d   : > { %2434 = vmatpush1.bf16.msra.mxu0 %v6149_v51  ;;  %v6320_v51 = vld [vmem:[#allocation8 + $0x1b0] ss:$24 sps:$4 sm:$0xff]  }
 0x17e   : > { %2435 = vmatprep.subr.bf16.mxu0 %v6154_v54  ;;  %v6326_v54 = vld [vmem:[#allocation8 + $0x1e0] ss:$24 sps:$4 sm:$0xff]  }
 0x17f   : > { %4389 = vmatpush1.bf16.msra.mxu1 %v6272_v8  ;;  %v6356_v8 = vld [vmem:[#allocation8 + $0x2d0] ss:$24 sps:$4 sm:$0xff]  }
 0x180   : > { %2262 = vmatmul.mubr.bf16.gmra.mrb[4].mxu0 %v7275_v55  ;;  %4390 = vmatprep.subr.bf16.mxu1 %v6280_v12  ;;  %v6364_v12 = vld [vmem:[#allocation8 + $0x304] ss:$24 sps:$4 sm:$0xff]  }
 0x181   : > { %2421 = vmatmul.mubr.bf16.gmra.mrb[4].mxu1 %v7275_v55  ;;  %2436 = vmatpush1.bf16.msra.mxu0 %v6152_v56  ;;  %v6328_v56 = vld [vmem:[#allocation8 + $0x1e4] ss:$24 sps:$4 sm:$0xff]  }
 0x182   : > { %2463 = vmatprep.mubr.bf16.mxu0 %v7209_v50  ;;  %2437 = vmatprep.subr.bf16.mxu0 %v6157_v57  ;;  %v6170_v50 = vld [vmem:[#allocation5 + $0x190] ss:$24 sps:$4 sm:$0xff]  }
 0x183   : > { %4391 = vmatpush1.bf16.msra.mxu1 %v6278_v13  ;;  %v6200_v57 = vld [vmem:[#allocation5 + $0x370] ss:$24 sps:$4 sm:$0xff]   ;;  %v6223_v13 = vld [vmem:[#allocation5 + $0x4c4] ss:$24 sps:$4 sm:$0xff]  }
 0x184   : > { %4392 = vmatprep.subr.bf16.mxu1 %v6286_v16  ;;  %v6224_v16 = vld [vmem:[#allocation5 + $0x4f0] ss:$24 sps:$4 sm:$0xff]  }
 0x185   : > { %2438 = vmatpush1.bf16.msra.mxu0 %v6155_v58  ;;  %v6205_v58 = vld [vmem:[#allocation5 + $0x3a4] ss:$24 sps:$4 sm:$0xff]  }
 0x186   : > { %2439 = vmatprep.subr.bf16.mxu0 %v6160_v59  ;;  %v6334_v59 = vld [vmem:[#allocation8 + $0x214] ss:$24 sps:$4 sm:$0xff]  }
 0x187   : > { %4393 = vmatpush1.bf16.msra.mxu1 %v6284_v17  ;;  %v6229_v17 = vld [vmem:[#allocation5 + $0x524] ss:$24 sps:$4 sm:$0xff]  }
 0x188   : > { %4394 = vmatprep.subr.bf16.mxu1 %v6292_v20  ;;  %v6230_v20 = vld [vmem:[#allocation5 + $0x550] ss:$24 sps:$4 sm:$0xff]  }
 0x189   : > { %2440 = vmatpush1.bf16.msra.mxu0 %v6158_v60  ;;  %v6203_v60 = vld [vmem:[#allocation5 + $0x3a0] ss:$24 sps:$4 sm:$0xff]  }
 0x18a   : > { %2441 = vmatprep.subr.bf16.mxu0 %v6163_v61  ;;  %v6208_v61 = vld [vmem:[#allocation5 + $0x3d4] ss:$24 sps:$4 sm:$0xff]  }
 0x18b   : > { %4395 = vmatpush1.bf16.msra.mxu1 %v6290_v21  ;;  %v6235_v21 = vld [vmem:[#allocation5 + $0x584] ss:$24 sps:$4 sm:$0xff]  }
 0x18c   : > { %4396 = vmatprep.subr.bf16.mxu1 %v6298_v25  ;;  %v6236_v25 = vld [vmem:[#allocation5 + $0x5b0] ss:$24 sps:$4 sm:$0xff]  }
 0x18d   : > { %2442 = vmatpush1.bf16.msra.mxu0 %v6161_v62  ;;  %v6340_v62 = vld [vmem:[#allocation8 + $0x244] ss:$24 sps:$4 sm:$0xff]  }
 0x18e   : > { %2443 = vmatprep.subr.bf16.mxu0 %v6166_v63  ;;  %v6206_v63 = vld [vmem:[#allocation5 + $0x3d0] ss:$24 sps:$4 sm:$0xff]  }
 0x18f   : > { %4397 = vmatpush1.bf16.msra.mxu1 %v6296_v26  ;;  %v6241_v26 = vld [vmem:[#allocation5 + $0x5e4] ss:$24 sps:$4 sm:$0xff]  }
 0x190   : > { %4398 = vmatprep.subr.bf16.mxu1 %v6304_v30  ;;  %v6242_v30 = vld [vmem:[#allocation5 + $0x610] ss:$24 sps:$4 sm:$0xff]  }
 0x191   : > { %2444 = vmatpush1.bf16.msra.mxu0 %v6164_v0  ;;  %v6211_v0 = vld [vmem:[#allocation5 + $0x404] ss:$24 sps:$4 sm:$0xff]  }
 0x192   : > { %2445 = vmatprep.subr.bf16.mxu0 %v6169_v1  ;;  %v6344_v1 = vld [vmem:[#allocation8 + $0x270] ss:$24 sps:$4 sm:$0xff]  }
 0x193   : > { %4399 = vmatpush1.bf16.msra.mxu1 %v6302_v32  ;;  %v6247_v32 = vld [vmem:[#allocation5 + $0x644] ss:$24 sps:$4 sm:$0xff]  }
 0x194   : > { %4400 = vmatprep.subr.bf16.mxu1 %v6310_v35  ;;  %v6248_v35 = vld [vmem:[#allocation5 + $0x670] ss:$24 sps:$4 sm:$0xff]  }
 0x195   : > { %2446 = vmatpush1.bf16.msra.mxu0 %v6167_v2  ;;  %v6346_v2 = vld [vmem:[#allocation8 + $0x274] ss:$24 sps:$4 sm:$0xff]  }
 0x196   : > { %2447 = vmatprep.subr.bf16.mxu0 %v6172_v3  ;;  %v6214_v3 = vld [vmem:[#allocation5 + $0x434] ss:$24 sps:$4 sm:$0xff]  }
 0x197   : > { %4401 = vmatpush1.bf16.msra.mxu1 %v6308_v36  ;;  %v6253_v36 = vld [vmem:[#allocation5 + $0x6a4] ss:$24 sps:$4 sm:$0xff]  }
 0x198   : > { %4402 = vmatprep.subr.bf16.mxu1 %v6316_v42  ;;  %v6262_v42 = vld [vmem:[#allocation5 + $0x734] ss:$24 sps:$4 sm:$0xff]  }
 0x199   : > { %2448 = vmatpush1.bf16.msra.mxu0 %v6170_v50  ;;  %v6217_v50 = vld [vmem:[#allocation5 + $0x464] ss:$24 sps:$4 sm:$0xff]  }
 0x19a   : > { %2449 = vmatprep.subr.bf16.mxu0 %v6175_v6  ;;  %v6215_v6 = vld [vmem:[#allocation5 + $0x460] ss:$24 sps:$4 sm:$0xff]  }
 0x19b   : > { %4403 = vmatpush1.bf16.msra.mxu1 %v6314_v43  ;;  %v6260_v43 = vld [vmem:[#allocation5 + $0x730] ss:$24 sps:$4 sm:$0xff]  }
 0x19c   : > { %4404 = vmatprep.subr.bf16.mxu1 %v6322_v48  ;;  %v6271_v48 = vld [vmem:[#allocation5 + $0x794] ss:$24 sps:$4 sm:$0xff]  }
 0x19d   : > { %2450 = vmatpush1.bf16.msra.mxu0 %v6173_v10  ;;  %v6220_v10 = vld [vmem:[#allocation5 + $0x494] ss:$24 sps:$4 sm:$0xff]  }
 0x19e   : > { %2451 = vmatprep.subr.bf16.mxu0 %v6178_v11  ;;  %v6218_v11 = vld [vmem:[#allocation5 + $0x490] ss:$24 sps:$4 sm:$0xff]  }
 0x19f   : > { %4405 = vmatpush1.bf16.msra.mxu1 %v6320_v51  ;;  %v6277_v51 = vld [vmem:[#allocation5 + $0x7c4] ss:$24 sps:$4 sm:$0xff]  }
 0x1a0   : > { %4406 = vmatprep.subr.bf16.mxu1 %v6328_v56  ;;  %v6289_v56 = vld [vmem:[#allocation5 + $0x824] ss:$24 sps:$4 sm:$0xff]  }
 0x1a1   : > { %2452 = vmatpush1.bf16.msra.mxu0 %v6176_v14  ;;  %v6221_v14 = vld [vmem:[#allocation5 + $0x4c0] ss:$24 sps:$4 sm:$0xff]  }
 0x1a2   : > { %2453 = vmatprep.subr.bf16.mxu0 %v6181_v15  ;;  %v6226_v15 = vld [vmem:[#allocation5 + $0x4f4] ss:$24 sps:$4 sm:$0xff]  }
 0x1a3   : > { %4407 = vmatpush1.bf16.msra.mxu1 %v6326_v54  ;;  %v6281_v54 = vld [vmem:[#allocation5 + $0x7f0] ss:$24 sps:$4 sm:$0xff]  }
 0x1a4   : > { %4408 = vmatprep.subr.bf16.mxu1 %v6334_v59  ;;  %v6293_v59 = vld [vmem:[#allocation5 + $0x850] ss:$24 sps:$4 sm:$0xff]  }
 0x1a5   : > { %2454 = vmatpush1.bf16.msra.mxu0 %v6179_v18  ;;  %v6227_v18 = vld [vmem:[#allocation5 + $0x520] ss:$24 sps:$4 sm:$0xff]  }
 0x1a6   : > { %2455 = vmatprep.subr.bf16.mxu0 %v6184_v19  ;;  %v6232_v19 = vld [vmem:[#allocation5 + $0x554] ss:$24 sps:$4 sm:$0xff]  }
 0x1a9   : > { %2456 = vmatpush1.bf16.msra.mxu0 %v6182_v22  ;;  %v6233_v22 = vld [vmem:[#allocation5 + $0x580] ss:$24 sps:$4 sm:$0xff]  }
 0x1aa   : > { %2457 = vmatprep.subr.bf16.mxu0 %v6187_v24  ;;  %v6238_v24 = vld [vmem:[#allocation5 + $0x5b4] ss:$24 sps:$4 sm:$0xff]  }
 0x1ad   : > { %2458 = vmatpush1.bf16.msra.mxu0 %v6185_v27  ;;  %v6239_v27 = vld [vmem:[#allocation5 + $0x5e0] ss:$24 sps:$4 sm:$0xff]  }
 0x1ae   : > { %2459 = vmatprep.subr.bf16.mxu0 %v6190_v28  ;;  %v6244_v28 = vld [vmem:[#allocation5 + $0x614] ss:$24 sps:$4 sm:$0xff]  }
 0x1b1   : > { %2460 = vmatpush1.bf16.msra.mxu0 %v6188_v33  ;;  %v6245_v33 = vld [vmem:[#allocation5 + $0x640] ss:$24 sps:$4 sm:$0xff]  }
 0x1b2   : > { %2461 = vmatprep.subr.bf16.mxu0 %v6193_v34  ;;  %v6250_v34 = vld [vmem:[#allocation5 + $0x674] ss:$24 sps:$4 sm:$0xff]  }
 0x1b5   : > { %2462 = vmatpush1.bf16.msra.mxu0 %v6191_v39  ;;  %v6251_v39 = vld [vmem:[#allocation5 + $0x6a0] ss:$24 sps:$4 sm:$0xff]  }
 0x1b6   : > { %2484 = vmatprep.subr.bf16.mxu0 %v6196_v40  ;;  %v6256_v40 = vld [vmem:[#allocation5 + $0x6d4] ss:$24 sps:$4 sm:$0xff]  }
 0x1b8   : > { %2464 = vmatmul.mubr.bf16.vlgmr.msra.gmra.mrb[8].mxu0 %v7215_v9  ;;  %v6332_v9 = vld [vmem:[#allocation8 + $0x210] ss:$24 sps:$4 sm:$0xff]  }
 0x1b9   : > { %2485 = vmatpush1.bf16.msra.mxu0 %v6194_v41  ;;  %2473 = vmatprep.mubr.bf16.mxu0 %v7221_v31  ;;  %v6338_v31 = vld [vmem:[#allocation8 + $0x240] ss:$24 sps:$4 sm:$0xff]  }
 0x1ba   : > { %2486 = vmatprep.subr.bf16.mxu0 %v6199_v47  ;;  %4409 = vmatpush1.bf16.msra.mxu1 %v6332_v9  ;;  %v6259_v41 = vld [vmem:[#allocation5 + $0x704] ss:$24 sps:$4 sm:$0xff]  }
 0x1bb   : > { %4410 = vmatprep.subr.bf16.mxu1 %v6340_v62  ;;  %v6265_v47 = vld [vmem:[#allocation5 + $0x764] ss:$24 sps:$4 sm:$0xff]  }
 0x1bc   : > { %v6301_v9 = vld [vmem:[#allocation5 + $0x884] ss:$24 sps:$4 sm:$0xff]  }
 0x1bd   : > { %2487 = vmatpush1.bf16.msra.mxu0 %v6197_v52  ;;  %v6275_v52 = vld [vmem:[#allocation5 + $0x7c0] ss:$24 sps:$4 sm:$0xff]   ;;  %v6313_v62 = vld [vmem:[#allocation5 + $0x8e4] ss:$24 sps:$4 sm:$0xff]  }
 0x1be   : > { %2488 = vmatprep.subr.bf16.mxu0 %v6202_v53  ;;  %4411 = vmatpush1.bf16.msra.mxu1 %v6338_v31  ;;  %v6283_v53 = vld [vmem:[#allocation5 + $0x7f4] ss:$24 sps:$4 sm:$0xff]   ;;  %v6305_v31 = vld [vmem:[#allocation5 + $0x8b0] ss:$24 sps:$4 sm:$0xff]  }
 0x1bf   : > { %4412 = vmatprep.subr.bf16.mxu1 %v6346_v2  ;;  %v6325_v2 = vld [vmem:[#allocation8 + $0x3c] ss:$24 sps:$4 sm:$0xff]  }
 0x1c0   : > { %2474 = vmatmul.mubr.bf16.gmra.mrb[12].mxu0 %v7227_v37  ;;  %v6209_v37 = vld [vmem:[#allocation5 + $0x400] ss:$24 sps:$4 sm:$0xff]  }
 0x1c1   : > { %2489 = vmatpush1.bf16.msra.mxu0 %v6200_v57  ;;  %2516 = vmatprep.mubr.bf16.mxu0 %v7231_v44  ;;  %v6352_v44 = vld [vmem:[#allocation8 + $0x2a4] ss:$24 sps:$4 sm:$0xff]  }
 0x1c2   : > { %2490 = vmatprep.subr.bf16.mxu0 %v6205_v58  ;;  %4413 = vmatpush1.bf16.msra.mxu1 %v6344_v1  ;;  %v6287_v57 = vld [vmem:[#allocation5 + $0x820] ss:$24 sps:$4 sm:$0xff]   ;;  %v6295_v58 = vld [vmem:[#allocation5 + $0x854] ss:$24 sps:$4 sm:$0xff]  }
 0x1c3   : > { %4414 = vmatprep.subr.bf16.mxu1 %v6352_v44  ;;  %v6317_v1 = vld [vmem:[#allocation8 + $0x8] ss:$24 sps:$4 sm:$0xff]  }
 0x1c4   : > { %v6329_v44 = vld [vmem:[#allocation8 + $0x68] ss:$24 sps:$4 sm:$0xff]  }
 0x1c5   : > { %2491 = vmatpush1.bf16.msra.mxu0 %v6203_v60  ;;  %v6299_v60 = vld [vmem:[#allocation5 + $0x880] ss:$24 sps:$4 sm:$0xff]  }
 0x1c6   : > { %2492 = vmatprep.subr.bf16.mxu0 %v6208_v61  ;;  %4415 = vmatpush1.bf16.msra.mxu1 %v6350_v5  ;;  %v6307_v61 = vld [vmem:[#allocation5 + $0x8b4] ss:$24 sps:$4 sm:$0xff]   ;;  %v6337_v5 = vld [vmem:[#allocation8 + $0x9c] ss:$24 sps:$4 sm:$0xff]  }
 0x1c7   : > { %4416 = vmatprep.subr.bf16.mxu1 %v6358_v7  ;;  %v6343_v7 = vld [vmem:[#allocation8 + $0xcc] ss:$24 sps:$4 sm:$0xff]  }
 0x1c9   : > { %2493 = vmatpush1.bf16.msra.mxu0 %v6206_v63  ;;  %v6311_v63 = vld [vmem:[#allocation5 + $0x8e0] ss:$24 sps:$4 sm:$0xff]  }
 0x1ca   : > { %2494 = vmatprep.subr.bf16.mxu0 %v6211_v0  ;;  %4417 = vmatpush1.bf16.msra.mxu1 %v6356_v8  ;;  %v6319_v0 = vld [vmem:[#allocation8 + $0xc] ss:$24 sps:$4 sm:$0xff]  }
 0x1cb   : > { %4439 = vmatprep.subr.bf16.mxu1 %v6364_v12 }
 0x1cd   : > { %2495 = vmatpush1.bf16.msra.mxu0 %v6209_v37  ;;  %v6323_v37 = vld [vmem:[#allocation8 + $0x38] ss:$24 sps:$4 sm:$0xff]  }
 0x1ce   : > { %2496 = vmatprep.subr.bf16.mxu0 %v6214_v3  ;;  %v6331_v3 = vld [vmem:[#allocation8 + $0x6c] ss:$24 sps:$4 sm:$0xff]  }
 0x1d1   : > { %2497 = vmatpush1.bf16.msra.mxu0 %v6212_v4  ;;  %v643_v4 = vlaneseq }
 0x1d2   : > { %2498 = vmatprep.subr.bf16.mxu0 %v6217_v50 }
 0x1d3   : > { %v7291_v50 = vshrl.u32 %v643_v4, 7 }
 0x1d5   : > { %2499 = vmatpush1.bf16.msra.mxu0 %v6215_v6  ;;  %v6335_v6 = vld [vmem:[#allocation8 + $0x98] ss:$24 sps:$4 sm:$0xff]   ;;  %v653_v8 = vsub.s32 2, %v7291_v50  ;;  %v657_v12 = vsub.s32 3, %v7291_v50 }
 0x1d6   : > { %2500 = vmatprep.subr.bf16.mxu0 %v6220_v10  ;;  %v7295_v10 = vld [vmem:[#allocation7] sm:$0x3f] }
 0x1d9   : > { %2501 = vmatpush1.bf16.msra.mxu0 %v6218_v11  ;;  %v649_v11 = vsub.s32 1, %v7291_v50 }
 0x1da   : > { %2502 = vmatprep.subr.bf16.mxu0 %v6223_v13 }
 0x1dd   : > { %2503 = vmatpush1.bf16.msra.mxu0 %v6221_v14  ;;  %v7305_v14 = vrot.slane %v7295_v10, %v653_v8 }
 0x1de   : > { %2504 = vmatprep.subr.bf16.mxu0 %v6226_v15  ;;  %v7310_v15 = vrot.slane %v7295_v10, %v649_v11 }
 0x1e1   : > { %2505 = vmatpush1.bf16.msra.mxu0 %v6224_v16  ;;  %v7315_v16 = vrot.slane %v7295_v10, %v657_v12 }
 0x1e2   : > { %2506 = vmatprep.subr.bf16.mxu0 %v6229_v17  ;;  %v6347_v17 = vld [vmem:[#allocation8 + $0xf8] ss:$24 sps:$4 sm:$0xff]  }
 0x1e5   : > { %2507 = vmatpush1.bf16.msra.mxu0 %v6227_v18  ;;  %v6355_v18 = vld [vmem:[#allocation8 + $0x12c] ss:$24 sps:$4 sm:$0xff]  }
 0x1e6   : > { %2508 = vmatprep.subr.bf16.mxu0 %v6232_v19 }
 0x1e9   : > { %2509 = vmatpush1.bf16.msra.mxu0 %v6230_v20 }
 0x1ea   : > { %2510 = vmatprep.subr.bf16.mxu0 %v6235_v21 }
 0x1ed   : > { %2511 = vmatpush1.bf16.msra.mxu0 %v6233_v22 }
 0x1ee   : > { %2512 = vmatprep.subr.bf16.mxu0 %v6238_v24 }
 0x1f1   : > { %2513 = vmatpush1.bf16.msra.mxu0 %v6236_v25 }
 0x1f2   : > { %2514 = vmatprep.subr.bf16.mxu0 %v6241_v26 }
 0x1f5   : > { %2515 = vmatpush1.bf16.msra.mxu0 %v6239_v27 }
 0x1f6   : > { %2537 = vmatprep.subr.bf16.mxu0 %v6244_v28 }
 0x1f8   : > { %2517 = vmatmul.mubr.bf16.vlgmr.msra.gmra.mrb[8].mxu0 %v7239_v23  ;;  %v6254_v23 = vld [vmem:[#allocation5 + $0x6d0] ss:$24 sps:$4 sm:$0xff]  }
 0x1f9   : > { %2538 = vmatpush1.bf16.msra.mxu0 %v6242_v30  ;;  %2526 = vmatprep.mubr.bf16.mxu0 %v7243_v29  ;;  %v6257_v29 = vld [vmem:[#allocation5 + $0x700] ss:$24 sps:$4 sm:$0xff]  }
 0x1fa   : > { %2539 = vmatprep.subr.bf16.mxu0 %v6247_v32  ;;  %v6353_v32 = vld [vmem:[#allocation8 + $0x128] ss:$24 sps:$4 sm:$0xff]  }
 0x1fd   : > { %2540 = vmatpush1.bf16.msra.mxu0 %v6245_v33 }
 0x1fe   : > { %2541 = vmatprep.subr.bf16.mxu0 %v6250_v34 }
 0x200   : > { %2527 = vmatmul.mubr.bf16.gmra.mrb[12].mxu0 %v7251_v38  ;;  %v6263_v38 = vld [vmem:[#allocation5 + $0x760] ss:$24 sps:$4 sm:$0xff]  }
 0x201   : > { %2542 = vmatpush1.bf16.msra.mxu0 %v6248_v35  ;;  %2569 = vmatprep.mubr.bf16.mxu0 %v7255_v45  ;;  %v6269_v45 = vld [vmem:[#allocation5 + $0x790] ss:$24 sps:$4 sm:$0xff]  }
 0x202   : > { %2543 = vmatprep.subr.bf16.mxu0 %v6253_v36 }
 0x205   : > { %2544 = vmatpush1.bf16.msra.mxu0 %v6251_v39 }
 0x206   : > { %2545 = vmatprep.subr.bf16.mxu0 %v6256_v40  ;;  %v6361_v40 = vld [vmem:[#allocation8 + $0x15c] ss:$24 sps:$4 sm:$0xff]  }
 0x209   : > { %2546 = vmatpush1.bf16.msra.mxu0 %v6254_v23 }
 0x20a   : > { %2547 = vmatprep.subr.bf16.mxu0 %v6259_v41 }
 0x20d   : > { %2548 = vmatpush1.bf16.msra.mxu0 %v6257_v29 }
 0x20e   : > { %2549 = vmatprep.subr.bf16.mxu0 %v6262_v42 }
 0x211   : > { %2550 = vmatpush1.bf16.msra.mxu0 %v6260_v43 }
 0x212   : > { %2551 = vmatprep.subr.bf16.mxu0 %v6265_v47 }
 0x215   : > { %2552 = vmatpush1.bf16.msra.mxu0 %v6263_v38 }
 0x216   : > { %2553 = vmatprep.subr.bf16.mxu0 %v6271_v48 }
 0x219   : > { %2554 = vmatpush1.bf16.msra.mxu0 %v6269_v45 }
 0x21a   : > { %2555 = vmatprep.subr.bf16.mxu0 %v6277_v51  ;;  %v6359_v51 = vld [vmem:[#allocation8 + $0x158] ss:$24 sps:$4 sm:$0xff]  }
 0x21d   : > { %2556 = vmatpush1.bf16.msra.mxu0 %v6275_v52 }
 0x21e   : > { %2557 = vmatprep.subr.bf16.mxu0 %v6283_v53 }
 0x221   : > { %2558 = vmatpush1.bf16.msra.mxu0 %v6281_v54 }
 0x222   : > { %2559 = vmatprep.subr.bf16.mxu0 %v6289_v56 }
 0x225   : > { %2560 = vmatpush1.bf16.msra.mxu0 %v6287_v57 }
 0x226   : > { %2561 = vmatprep.subr.bf16.mxu0 %v6295_v58  ;;  %v6362_v58 = vld [vmem:[#allocation8 + $0x300] ss:$24 sps:$4 sm:$0xff]  }
 0x229   : > { %2562 = vmatpush1.bf16.msra.mxu0 %v6293_v59  ;;  %v6367_v59 = vld [vmem:[#allocation8 + $0x18c] ss:$24 sps:$4 sm:$0xff]  }
 0x22a   : > { %2563 = vmatprep.subr.bf16.mxu0 %v6301_v9 }
 0x22d   : > { %2564 = vmatpush1.bf16.msra.mxu0 %v6299_v60 }
 0x22e   : > { %2565 = vmatprep.subr.bf16.mxu0 %v6307_v61 }
 0x231   : > { %2566 = vmatpush1.bf16.msra.mxu0 %v6305_v31  ;;  %v6370_v31 = vld [vmem:[#allocation8 + $0x334] ss:$24 sps:$4 sm:$0xff]  }
 0x232   : > { %2567 = vmatprep.subr.bf16.mxu0 %v6313_v62 }
 0x235   : > { %2568 = vmatpush1.bf16.msra.mxu0 %v6311_v63 }
 0x236   : > { %4545 = vmatprep.subr.bf16.mxu0 %v6319_v0 }
 0x238   : > { %2570 = vmatmul.mubr.bf16.vlgmr.msra.gmra.mrb[8].mxu0 %v7265_v46  ;;  %v645_v46 = vsub.s32 0, %v7291_v50 }
 0x239   : > { %4546 = vmatpush1.bf16.msra.mxu0 %v6317_v1  ;;  %2579 = vmatprep.mubr.bf16.mxu0 %v7267_v49  ;;  %v6341_v49 = vld [vmem:[#allocation8 + $0xc8] ss:$24 sps:$4 sm:$0xff]  }
 0x23a   : > { %4547 = vmatprep.subr.bf16.mxu0 %v6325_v2  ;;  %v646_v13 = vrot.slane %v7295_v10, %v645_v46  ;;  %v6365_v2 = vld [vmem:[#allocation8 + $0x188] ss:$24 sps:$4 sm:$0xff]  }
 0x23d   : > { %4548 = vmatpush1.bf16.msra.mxu0 %v6323_v37 }
 0x23e   : > { %4549 = vmatprep.subr.bf16.mxu0 %v6331_v3 }
 0x240   : > { %2580 = vmatmul.mubr.bf16.gmra.mrb[12].mxu0 %v7275_v55  ;;  %v6349_v55 = vld [vmem:[#allocation8 + $0xfc] ss:$24 sps:$4 sm:$0xff]  }
 0x241   : > { %4550 = vmatpush1.bf16.msra.mxu0 %v6329_v44 }
 0x242   : > { %4551 = vmatprep.subr.bf16.mxu0 %v6337_v5  ;;  %v6373_v5 = vld [vmem:[#allocation8 + $0x1bc] ss:$24 sps:$4 sm:$0xff]  }
 0x245   : > { %4552 = vmatpush1.bf16.msra.mxu0 %v6335_v6 }
 0x246   : > { %4553 = vmatprep.subr.bf16.mxu0 %v6343_v7 }
 0x249   : > { %4554 = vmatpush1.bf16.msra.mxu0 %v6341_v49 }
 0x24a   : > { %4555 = vmatprep.subr.bf16.mxu0 %v6349_v55 }
 0x24b   : > { %v2253_v19 = vpop.f32.mrb[0].mxu0 }
 0x24c   : > { %v2412_v20 = vpop.f32.mrb[0].mxu1  ;;  %v5624_v21 = vadd.f32 %v2253_v19, %v646_v13  ;;  %v2255_v24 = vpop.f32.mrb[1].mxu0 }
 0x24d   : > { %v5632_v22 = vadd.f32 %v2412_v20, %v7305_v14  ;;  %v2414_v25 = vpop.f32.mrb[1].mxu1  ;;  %v5625_v26 = vadd.f32 %v2255_v24, %v7310_v15  ;;  %v2257_v28 = vpop.f32.mrb[2].mxu0  ;;  %4556 = vmatpush1.bf16.msra.mxu0 %v6347_v17  ;;  %v6368_v17 = vld [vmem:[#allocation8 + $0x330] ss:$24 sps:$4 sm:$0xff]  }
 0x24e   : > { %v5633_v27 = vadd.f32 %v2414_v25, %v7315_v16  ;;  %v2416_v30 = vpop.f32.mrb[2].mxu1  ;;  %v5626_v34 = vadd.f32 %v2257_v28, %v646_v13  ;;  %v2259_v36 = vpop.f32.mrb[3].mxu0  ;;  %4557 = vmatprep.subr.bf16.mxu0 %v6355_v18  ;;  %v2590_v29 = vmax.f32 %v5624_v21, 0.0  ;;  %v6376_v21 = vld [vmem:[#allocation8 + $0x364] ss:$24 sps:$4 sm:$0xff]  }
 0x24f   : > { %v2592_v33 = vmax.f32 %v5632_v22, 0.0  ;;  %v5634_v35 = vadd.f32 %v2416_v30, %v7305_v14  ;;  %v2418_v39 = vpop.f32.mrb[3].mxu1  ;;  %v5627_v23 = vadd.f32 %v2259_v36, %v7310_v15  ;;  %v2591_v47 = vmax.f32 %v5625_v26, 0.0  ;;  %v6371_v26 = vld [vmem:[#allocation8 + $0x1b8] ss:$24 sps:$4 sm:$0xff]  }
 0x250   : > { %v5635_v41 = vadd.f32 %v2418_v39, %v7315_v16  ;;  %v2596_v42 = vmax.f32 %v5626_v34, 0.0  ;;  %v2593_v38 = vmax.f32 %v5633_v27, 0.0  ;;  %v6377_v34 = vld [vmem:[#allocation8 + $0x1e8] ss:$24 sps:$4 sm:$0xff]   ;;  %v6388_v39 = vld [vmem:[#allocation8 + $0x3c4] ss:$24 sps:$4 sm:$0xff]  }
 0x251   : > { %v2598_v43 = vmax.f32 %v5634_v35, 0.0  ;;  %v2597_v48 = vmax.f32 %v5627_v23, 0.0  ;;  %4558 = vmatpush1.bf16.msra.mxu0 %v6353_v32  ;;  %v6385_v35 = vld [vmem:[#allocation8 + $0x21c] ss:$24 sps:$4 sm:$0xff]   ;;  %v6380_v36 = vld [vmem:[#allocation8 + $0x390] ss:$24 sps:$4 sm:$0xff]  }
 0x252   : > { %v2599_v45 = vmax.f32 %v5635_v41, 0.0  ;;  %v7323_v52 = vpack.c.bf16 %v2596_v42, %v2590_v29  ;;  %4559 = vmatprep.subr.bf16.mxu0 %v6361_v40  ;;  %v6383_v40 = vld [vmem:[#allocation8 + $0x218] ss:$24 sps:$4 sm:$0xff]   ;;  %v6391_v23 = vld [vmem:[#allocation8 + $0x24c] ss:$24 sps:$4 sm:$0xff]  }
 0x253   : > { %v7325_v53 = vpack.c.bf16 %v2598_v43, %v2592_v33  ;;  %v7327_v54 = vpack.c.bf16 %v2597_v48, %v2591_v47  ;;  %v2263_v57 = vpop.f32.mrb[4].mxu0  ;;  %v6382_v33 = vld [vmem:[#allocation8 + $0x394] ss:$24 sps:$4 sm:$0xff]   ;;  %v6386_v41 = vld [vmem:[#allocation8 + $0x3c0] ss:$24 sps:$4 sm:$0xff]  }
 0x254   : > { %v7329_v56 = vpack.c.bf16 %v2599_v45, %v2593_v38  ;;  %v2422_v9 = vpop.f32.mrb[4].mxu1  ;;  %v5628_v60 = vadd.f32 %v2263_v57, %v646_v13  ;;  %v2265_v61 = vpop.f32.mrb[5].mxu0  ;;  %v6394_v29 = vld [vmem:[#allocation8 + $0x3f4] ss:$24 sps:$4 sm:$0xff]   ;;  %v6389_v42 = vld [vmem:[#allocation8 + $0x248] ss:$24 sps:$4 sm:$0xff]  }
 0x255   : > { %v5636_v62 = vadd.f32 %v2422_v9, %v7305_v14  ;;  %v2424_v63 = vpop.f32.mrb[5].mxu1  ;;  %v5629_v0 = vadd.f32 %v2265_v61, %v7310_v15  ;;  %v2267_v1 = vpop.f32.mrb[6].mxu0  ;;  %4418 = vmatprep.mubr.bf16.mxu1 %v7327_v54  ;;  %4560 = vmatpush1.bf16.msra.mxu0 %v6359_v51  ;;  %v6397_v43 = vld [vmem:[#allocation8 + $0x27c] ss:$24 sps:$4 sm:$0xff]   ;;  %v6392_v47 = vld [vmem:[#allocation8 + $0x3f0] ss:$24 sps:$4 sm:$0xff]  }
 0x256   : > { %v5637_v37 = vadd.f32 %v2424_v63, %v7315_v16  ;;  %v2426_v3 = vpop.f32.mrb[6].mxu1  ;;  %v5630_v4 = vadd.f32 %v2267_v1, %v646_v13  ;;  %4577 = vmatprep.mubr.bf16.mxu0 %v7327_v54  ;;  %v2269_v44 = vpop.f32.mrb[7].mxu0  ;;  %4419 = vmatmul.mubr.bf16.vlgmr.msra.gmra.mrb[8].mxu1 %v7323_v52  ;;  %v2602_v20 = vmax.f32 %v5628_v60, 0.0  ;;  %v6400_v38 = vld [vmem:[#allocation8 + $0x424] ss:$24 sps:$4 sm:$0xff]  }
 0x257   : > { %v2604_v6 = vmax.f32 %v5636_v62, 0.0  ;;  %v5638_v7 = vadd.f32 %v2426_v3, %v7305_v14  ;;  %v2428_v49 = vpop.f32.mrb[7].mxu1  ;;  %v5631_v55 = vadd.f32 %v2269_v44, %v7310_v15  ;;  %4440 = vmatpush1.bf16.msra.mxu1 %v6362_v58  ;;  %4561 = vmatprep.subr.bf16.mxu0 %v6367_v59  ;;  %v2603_v24 = vmax.f32 %v5629_v0, 0.0  ;;  %v6379_v15 = vld [vmem:[#allocation8 + $0x1ec] ss:$24 sps:$4 sm:$0xff]  }
 0x258   : > { %v2605_v18 = vmax.f32 %v5637_v37, 0.0  ;;  %v5639_v19 = vadd.f32 %v2428_v49, %v7315_v16  ;;  %v2608_v13 = vmax.f32 %v5630_v4, 0.0  ;;  %4441 = vmatprep.subr.bf16.mxu1 %v6370_v31  ;;  %v6374_v16 = vld [vmem:[#allocation8 + $0x360] ss:$24 sps:$4 sm:$0xff]   ;;  %v6403_v45 = vld [vmem:[#allocation8 + $0x2ac] ss:$24 sps:$4 sm:$0xff]  }
 0x259   : > { %v2610_v22 = vmax.f32 %v5638_v7, 0.0  ;;  %v2609_v25 = vmax.f32 %v5631_v55, 0.0  ;;  %4562 = vmatpush1.bf16.msra.mxu0 %v6365_v2  ;;  %v6395_v48 = vld [vmem:[#allocation8 + $0x278] ss:$24 sps:$4 sm:$0xff]   ;;  %v6406_v57 = vld [vmem:[#allocation8 + $0x454] ss:$24 sps:$4 sm:$0xff]  }
 0x25a   : > { %v2611_v27 = vmax.f32 %v5639_v19, 0.0  ;;  %v7340_v14 = vpack.c.bf16 %v2608_v13, %v2602_v20  ;;  %4563 = vmatprep.subr.bf16.mxu0 %v6373_v5  ;;  %v6398_v51 = vld [vmem:[#allocation8 + $0x420] ss:$24 sps:$4 sm:$0xff]   ;;  %v6409_v59 = vld [vmem:[#allocation8 + $0x2dc] ss:$24 sps:$4 sm:$0xff]  }
 0x25b   : > { %v7342_v28 = vpack.c.bf16 %v2610_v22, %v2604_v6  ;;  %v7344_v30 = vpack.c.bf16 %v2609_v25, %v2603_v24  ;;  %4442 = vmatpush1.bf16.msra.mxu1 %v6368_v17  ;;  %v6401_v58 = vld [vmem:[#allocation8 + $0x2a8] ss:$24 sps:$4 sm:$0xff]   ;;  %v6412_v60 = vld [vmem:[#allocation8 + $0x484] ss:$24 sps:$4 sm:$0xff]   ;;  %v6407_v61 = vld [vmem:[#allocation8 + $0x2d8] ss:$24 sps:$4 sm:$0xff]  }
 0x25c   : > { %v7346_v32 = vpack.c.bf16 %v2611_v27, %v2605_v18  ;;  %4443 = vmatprep.subr.bf16.mxu1 %v6376_v21  ;;  %v6404_v9 = vld [vmem:[#allocation8 + $0x450] ss:$24 sps:$4 sm:$0xff]   ;;  %v6415_v31 = vld [vmem:[#allocation8 + $0x30c] ss:$24 sps:$4 sm:$0xff]   ;;  %v6410_v62 = vld [vmem:[#allocation8 + $0x480] ss:$24 sps:$4 sm:$0xff]  }
 0x25d   : > { %4428 = vmatprep.mubr.bf16.mxu1 %v7344_v30  ;;  %4564 = vmatpush1.bf16.msra.mxu0 %v6371_v26  ;;  %v6418_v63 = vld [vmem:[#allocation8 + $0x4b4] ss:$24 sps:$4 sm:$0xff]   ;;  %v6413_v0 = vld [vmem:[#allocation8 + $0x308] ss:$24 sps:$4 sm:$0xff]   ;;  %v6424_v37 = vld [vmem:[#allocation8 + $0x4e4] ss:$24 sps:$4 sm:$0xff]  }
 0x25e   : > { %4429 = vmatmul.mubr.bf16.gmra.mrb[12].mxu1 %v7340_v14  ;;  %4565 = vmatprep.subr.bf16.mxu0 %v6379_v15  ;;  %v6421_v1 = vld [vmem:[#allocation8 + $0x33c] ss:$24 sps:$4 sm:$0xff]   ;;  %v6416_v2 = vld [vmem:[#allocation8 + $0x4b0] ss:$24 sps:$4 sm:$0xff]   ;;  %v6427_v4 = vld [vmem:[#allocation8 + $0x36c] ss:$24 sps:$4 sm:$0xff]  }
 0x25f   : > { %4444 = vmatpush1.bf16.msra.mxu1 %v6374_v16  ;;  %4471 = vmatprep.mubr.bf16.mxu1 %v7329_v56  ;;  %v6419_v3 = vld [vmem:[#allocation8 + $0x338] ss:$24 sps:$4 sm:$0xff]   ;;  %v6430_v5 = vld [vmem:[#allocation8 + $0x514] ss:$24 sps:$4 sm:$0xff]   ;;  %v6425_v6 = vld [vmem:[#allocation8 + $0x368] ss:$24 sps:$4 sm:$0xff]  }
 0x260   : > { %4445 = vmatprep.subr.bf16.mxu1 %v6382_v33  ;;  %v6422_v44 = vld [vmem:[#allocation8 + $0x4e0] ss:$24 sps:$4 sm:$0xff]   ;;  %v6433_v7 = vld [vmem:[#allocation8 + $0x39c] ss:$24 sps:$4 sm:$0xff]   ;;  %v6428_v49 = vld [vmem:[#allocation8 + $0x510] ss:$24 sps:$4 sm:$0xff]  }
 0x261   : > { %4566 = vmatpush1.bf16.msra.mxu0 %v6377_v34  ;;  %v6436_v55 = vld [vmem:[#allocation8 + $0x544] ss:$24 sps:$4 sm:$0xff]   ;;  %v6431_v17 = vld [vmem:[#allocation8 + $0x398] ss:$24 sps:$4 sm:$0xff]   ;;  %v6442_v20 = vld [vmem:[#allocation8 + $0x574] ss:$24 sps:$4 sm:$0xff]  }
 0x262   : > { %4567 = vmatprep.subr.bf16.mxu0 %v6385_v35  ;;  %v6439_v18 = vld [vmem:[#allocation8 + $0x3cc] ss:$24 sps:$4 sm:$0xff]   ;;  %v6434_v19 = vld [vmem:[#allocation8 + $0x540] ss:$24 sps:$4 sm:$0xff]   ;;  %v6445_v21 = vld [vmem:[#allocation8 + $0x3fc] ss:$24 sps:$4 sm:$0xff]  }
 0x263   : > { %4446 = vmatpush1.bf16.msra.mxu1 %v6380_v36  ;;  %v6437_v13 = vld [vmem:[#allocation8 + $0x3c8] ss:$24 sps:$4 sm:$0xff]   ;;  %v6448_v24 = vld [vmem:[#allocation8 + $0x5a4] ss:$24 sps:$4 sm:$0xff]   ;;  %v6443_v25 = vld [vmem:[#allocation8 + $0x3f8] ss:$24 sps:$4 sm:$0xff]  }
 0x264   : > { %4447 = vmatprep.subr.bf16.mxu1 %v6388_v39  ;;  %v6440_v22 = vld [vmem:[#allocation8 + $0x570] ss:$24 sps:$4 sm:$0xff]   ;;  %v6451_v26 = vld [vmem:[#allocation8 + $0x42c] ss:$24 sps:$4 sm:$0xff]   ;;  %v6446_v27 = vld [vmem:[#allocation8 + $0x5a0] ss:$24 sps:$4 sm:$0xff]  }
 0x265   : > { %4568 = vmatpush1.bf16.msra.mxu0 %v6383_v40  ;;  %v6454_v15 = vld [vmem:[#allocation8 + $0x5d4] ss:$24 sps:$4 sm:$0xff]   ;;  %v6449_v16 = vld [vmem:[#allocation8 + $0x428] ss:$24 sps:$4 sm:$0xff]   ;;  %v6484_v35 = vld [vmem:[#allocation8 + $0x604] ss:$24 sps:$4 sm:$0xff]  }
 0x266   : > { %4569 = vmatprep.subr.bf16.mxu0 %v6391_v23  ;;  %v6457_v33 = vld [vmem:[#allocation8 + $0x45c] ss:$24 sps:$4 sm:$0xff]   ;;  %v6452_v34 = vld [vmem:[#allocation8 + $0x5d0] ss:$24 sps:$4 sm:$0xff]   ;;  %v6460_v39 = vld [vmem:[#allocation8 + $0x48c] ss:$24 sps:$4 sm:$0xff]  }
 0x267   : > { %4448 = vmatpush1.bf16.msra.mxu1 %v6386_v41  ;;  %v6455_v36 = vld [vmem:[#allocation8 + $0x458] ss:$24 sps:$4 sm:$0xff]   ;;  %v6490_v23 = vld [vmem:[#allocation8 + $0x634] ss:$24 sps:$4 sm:$0xff]   ;;  %v6458_v41 = vld [vmem:[#allocation8 + $0x488] ss:$24 sps:$4 sm:$0xff]  }
 0x268   : > { %4449 = vmatprep.subr.bf16.mxu1 %v6394_v29  ;;  %v6482_v40 = vld [vmem:[#allocation8 + $0x600] ss:$24 sps:$4 sm:$0xff]   ;;  %v6463_v29 = vld [vmem:[#allocation8 + $0x4bc] ss:$24 sps:$4 sm:$0xff]  }
 0x269   : > { %4570 = vmatpush1.bf16.msra.mxu0 %v6389_v42  ;;  %v6488_v42 = vld [vmem:[#allocation8 + $0x630] ss:$24 sps:$4 sm:$0xff]  }
 0x26a   : > { %4571 = vmatprep.subr.bf16.mxu0 %v6397_v43  ;;  %v6496_v43 = vld [vmem:[#allocation8 + $0x664] ss:$24 sps:$4 sm:$0xff]  }
 0x26b   : > { %4450 = vmatpush1.bf16.msra.mxu1 %v6392_v47  ;;  %v6461_v47 = vld [vmem:[#allocation8 + $0x4b8] ss:$24 sps:$4 sm:$0xff]  }
 0x26c   : > { %4451 = vmatprep.subr.bf16.mxu1 %v6400_v38  ;;  %v6466_v38 = vld [vmem:[#allocation8 + $0x4ec] ss:$24 sps:$4 sm:$0xff]  }
 0x26d   : > { %4572 = vmatpush1.bf16.msra.mxu0 %v6395_v48  ;;  %v6494_v48 = vld [vmem:[#allocation8 + $0x660] ss:$24 sps:$4 sm:$0xff]  }
 0x26e   : > { %4573 = vmatprep.subr.bf16.mxu0 %v6403_v45  ;;  %v6502_v45 = vld [vmem:[#allocation8 + $0x694] ss:$24 sps:$4 sm:$0xff]  }
 0x26f   : > { %4452 = vmatpush1.bf16.msra.mxu1 %v6398_v51  ;;  %v6464_v51 = vld [vmem:[#allocation8 + $0x4e8] ss:$24 sps:$4 sm:$0xff]  }
 0x270   : > { %4453 = vmatprep.subr.bf16.mxu1 %v6406_v57  ;;  %v6469_v57 = vld [vmem:[#allocation8 + $0x51c] ss:$24 sps:$4 sm:$0xff]  }
 0x271   : > { %4574 = vmatpush1.bf16.msra.mxu0 %v6401_v58  ;;  %v6500_v58 = vld [vmem:[#allocation8 + $0x690] ss:$24 sps:$4 sm:$0xff]  }
 0x272   : > { %4575 = vmatprep.subr.bf16.mxu0 %v6409_v59  ;;  %v6508_v59 = vld [vmem:[#allocation8 + $0x6c4] ss:$24 sps:$4 sm:$0xff]  }
 0x273   : > { %4454 = vmatpush1.bf16.msra.mxu1 %v6404_v9  ;;  %v6467_v9 = vld [vmem:[#allocation8 + $0x518] ss:$24 sps:$4 sm:$0xff]  }
 0x274   : > { %4455 = vmatprep.subr.bf16.mxu1 %v6412_v60  ;;  %v6472_v60 = vld [vmem:[#allocation8 + $0x54c] ss:$24 sps:$4 sm:$0xff]  }
 0x275   : > { %4576 = vmatpush1.bf16.msra.mxu0 %v6407_v61  ;;  %v6506_v61 = vld [vmem:[#allocation8 + $0x6c0] ss:$24 sps:$4 sm:$0xff]  }
 0x276   : > { %4598 = vmatprep.subr.bf16.mxu0 %v6415_v31  ;;  %v6514_v31 = vld [vmem:[#allocation8 + $0x6f4] ss:$24 sps:$4 sm:$0xff]  }
 0x277   : > { %4456 = vmatpush1.bf16.msra.mxu1 %v6410_v62  ;;  %v6470_v62 = vld [vmem:[#allocation8 + $0x548] ss:$24 sps:$4 sm:$0xff]  }
 0x278   : > { %4578 = vmatmul.mubr.bf16.vlgmr.msra.gmra.mrb[16].mxu0 %v7323_v52  ;;  %4457 = vmatprep.subr.bf16.mxu1 %v6418_v63  ;;  %v6475_v63 = vld [vmem:[#allocation8 + $0x57c] ss:$24 sps:$4 sm:$0xff]  }
 0x279   : > { %4587 = vmatprep.mubr.bf16.mxu0 %v7344_v30  ;;  %4599 = vmatpush1.bf16.msra.mxu0 %v6413_v0  ;;  %v6512_v0 = vld [vmem:[#allocation8 + $0x6f0] ss:$24 sps:$4 sm:$0xff]  }
 0x27a   : > { %4600 = vmatprep.subr.bf16.mxu0 %v6421_v1  ;;  %v6520_v1 = vld [vmem:[#allocation8 + $0x724] ss:$24 sps:$4 sm:$0xff]  }
 0x27b   : > { %4458 = vmatpush1.bf16.msra.mxu1 %v6416_v2  ;;  %v6473_v2 = vld [vmem:[#allocation8 + $0x578] ss:$24 sps:$4 sm:$0xff]  }
 0x27c   : > { %4459 = vmatprep.subr.bf16.mxu1 %v6424_v37  ;;  %v6478_v37 = vld [vmem:[#allocation8 + $0x5ac] ss:$24 sps:$4 sm:$0xff]  }
 0x27d   : > { %4601 = vmatpush1.bf16.msra.mxu0 %v6419_v3  ;;  %v6518_v3 = vld [vmem:[#allocation8 + $0x720] ss:$24 sps:$4 sm:$0xff]  }
 0x27e   : > { %4602 = vmatprep.subr.bf16.mxu0 %v6427_v4  ;;  %v6526_v4 = vld [vmem:[#allocation8 + $0x754] ss:$24 sps:$4 sm:$0xff]  }
 0x27f   : > { %4460 = vmatpush1.bf16.msra.mxu1 %v6422_v44  ;;  %v6476_v44 = vld [vmem:[#allocation8 + $0x5a8] ss:$24 sps:$4 sm:$0xff]  }
 0x280   : > { %4588 = vmatmul.mubr.bf16.gmra.mrb[20].mxu0 %v7340_v14  ;;  %4461 = vmatprep.subr.bf16.mxu1 %v6430_v5  ;;  %v6481_v5 = vld [vmem:[#allocation8 + $0x5dc] ss:$24 sps:$4 sm:$0xff]  }
 0x281   : > { %4603 = vmatpush1.bf16.msra.mxu0 %v6425_v6  ;;  %4630 = vmatprep.mubr.bf16.mxu0 %v7329_v56  ;;  %v6524_v6 = vld [vmem:[#allocation8 + $0x750] ss:$24 sps:$4 sm:$0xff]  }
 0x282   : > { %4604 = vmatprep.subr.bf16.mxu0 %v6433_v7  ;;  %v6532_v7 = vld [vmem:[#allocation8 + $0x784] ss:$24 sps:$4 sm:$0xff]  }
 0x283   : > { %4462 = vmatpush1.bf16.msra.mxu1 %v6428_v49  ;;  %v6479_v49 = vld [vmem:[#allocation8 + $0x5d8] ss:$24 sps:$4 sm:$0xff]  }
 0x284   : > { %4463 = vmatprep.subr.bf16.mxu1 %v6436_v55  ;;  %v6487_v55 = vld [vmem:[#allocation8 + $0x60c] ss:$24 sps:$4 sm:$0xff]  }
 0x285   : > { %4605 = vmatpush1.bf16.msra.mxu0 %v6431_v17  ;;  %v6530_v17 = vld [vmem:[#allocation8 + $0x780] ss:$24 sps:$4 sm:$0xff]  }
 0x286   : > { %4606 = vmatprep.subr.bf16.mxu0 %v6439_v18  ;;  %v6538_v18 = vld [vmem:[#allocation8 + $0x7b4] ss:$24 sps:$4 sm:$0xff]  }
 0x287   : > { %4464 = vmatpush1.bf16.msra.mxu1 %v6434_v19  ;;  %v6485_v19 = vld [vmem:[#allocation8 + $0x608] ss:$24 sps:$4 sm:$0xff]  }
 0x288   : > { %4465 = vmatprep.subr.bf16.mxu1 %v6442_v20  ;;  %v6493_v20 = vld [vmem:[#allocation8 + $0x63c] ss:$24 sps:$4 sm:$0xff]  }
 0x289   : > { %4607 = vmatpush1.bf16.msra.mxu0 %v6437_v13  ;;  %v6536_v13 = vld [vmem:[#allocation8 + $0x7b0] ss:$24 sps:$4 sm:$0xff]  }
 0x28a   : > { %4608 = vmatprep.subr.bf16.mxu0 %v6445_v21  ;;  %v6544_v21 = vld [vmem:[#allocation8 + $0x7e4] ss:$24 sps:$4 sm:$0xff]  }
 0x28b   : > { %4466 = vmatpush1.bf16.msra.mxu1 %v6440_v22  ;;  %v6491_v22 = vld [vmem:[#allocation8 + $0x638] ss:$24 sps:$4 sm:$0xff]  }
 0x28c   : > { %4467 = vmatprep.subr.bf16.mxu1 %v6448_v24  ;;  %v6499_v24 = vld [vmem:[#allocation8 + $0x66c] ss:$24 sps:$4 sm:$0xff]  }
 0x28d   : > { %4609 = vmatpush1.bf16.msra.mxu0 %v6443_v25  ;;  %v6542_v25 = vld [vmem:[#allocation8 + $0x7e0] ss:$24 sps:$4 sm:$0xff]  }
 0x28e   : > { %4610 = vmatprep.subr.bf16.mxu0 %v6451_v26  ;;  %v6550_v26 = vld [vmem:[#allocation8 + $0x814] ss:$24 sps:$4 sm:$0xff]  }
 0x28f   : > { %4468 = vmatpush1.bf16.msra.mxu1 %v6446_v27  ;;  %v6497_v27 = vld [vmem:[#allocation8 + $0x668] ss:$24 sps:$4 sm:$0xff]  }
 0x290   : > { %4469 = vmatprep.subr.bf16.mxu1 %v6454_v15  ;;  %v6505_v15 = vld [vmem:[#allocation8 + $0x69c] ss:$24 sps:$4 sm:$0xff]  }
 0x291   : > { %4611 = vmatpush1.bf16.msra.mxu0 %v6449_v16  ;;  %v6548_v16 = vld [vmem:[#allocation8 + $0x810] ss:$24 sps:$4 sm:$0xff]  }
 0x292   : > { %4612 = vmatprep.subr.bf16.mxu0 %v6457_v33  ;;  %v6556_v33 = vld [vmem:[#allocation8 + $0x844] ss:$24 sps:$4 sm:$0xff]  }
 0x293   : > { %4470 = vmatpush1.bf16.msra.mxu1 %v6452_v34  ;;  %v6503_v34 = vld [vmem:[#allocation8 + $0x698] ss:$24 sps:$4 sm:$0xff]  }
 0x294   : > { %4492 = vmatprep.subr.bf16.mxu1 %v6484_v35  ;;  %v6511_v35 = vld [vmem:[#allocation8 + $0x6cc] ss:$24 sps:$4 sm:$0xff]  }
 0x295   : > { %4613 = vmatpush1.bf16.msra.mxu0 %v6455_v36  ;;  %v6554_v36 = vld [vmem:[#allocation8 + $0x840] ss:$24 sps:$4 sm:$0xff]  }
 0x296   : > { %4472 = vmatmul.mubr.bf16.vlgmr.msra.gmra.mrb[8].mxu1 %v7325_v53  ;;  %4614 = vmatprep.subr.bf16.mxu0 %v6460_v39  ;;  %v6562_v39 = vld [vmem:[#allocation8 + $0x874] ss:$24 sps:$4 sm:$0xff]  }
 0x297   : > { %4481 = vmatprep.mubr.bf16.mxu1 %v7346_v32  ;;  %4493 = vmatpush1.bf16.msra.mxu1 %v6482_v40  ;;  %v6509_v40 = vld [vmem:[#allocation8 + $0x6c8] ss:$24 sps:$4 sm:$0xff]  }
 0x298   : > { %4494 = vmatprep.subr.bf16.mxu1 %v6490_v23  ;;  %v6517_v23 = vld [vmem:[#allocation8 + $0x6fc] ss:$24 sps:$4 sm:$0xff]  }
 0x299   : > { %4615 = vmatpush1.bf16.msra.mxu0 %v6458_v41  ;;  %v6560_v41 = vld [vmem:[#allocation8 + $0x870] ss:$24 sps:$4 sm:$0xff]  }
 0x29a   : > { %4616 = vmatprep.subr.bf16.mxu0 %v6463_v29  ;;  %v6568_v29 = vld [vmem:[#allocation8 + $0x8a4] ss:$24 sps:$4 sm:$0xff]  }
 0x29b   : > { %4495 = vmatpush1.bf16.msra.mxu1 %v6488_v42  ;;  %v6515_v42 = vld [vmem:[#allocation8 + $0x6f8] ss:$24 sps:$4 sm:$0xff]  }
 0x29c   : > { %4496 = vmatprep.subr.bf16.mxu1 %v6496_v43  ;;  %v6523_v43 = vld [vmem:[#allocation8 + $0x72c] ss:$24 sps:$4 sm:$0xff]  }
 0x29d   : > { %4617 = vmatpush1.bf16.msra.mxu0 %v6461_v47  ;;  %v6566_v47 = vld [vmem:[#allocation8 + $0x8a0] ss:$24 sps:$4 sm:$0xff]  }
 0x29e   : > { %4482 = vmatmul.mubr.bf16.gmra.mrb[12].mxu1 %v7342_v28  ;;  %4618 = vmatprep.subr.bf16.mxu0 %v6466_v38  ;;  %v6574_v38 = vld [vmem:[#allocation8 + $0x8d4] ss:$24 sps:$4 sm:$0xff]  }
 0x29f   : > { %4497 = vmatpush1.bf16.msra.mxu1 %v6494_v48  ;;  %v6521_v48 = vld [vmem:[#allocation8 + $0x728] ss:$24 sps:$4 sm:$0xff]  }
 0x2a0   : > { %4498 = vmatprep.subr.bf16.mxu1 %v6502_v45  ;;  %v6529_v45 = vld [vmem:[#allocation8 + $0x75c] ss:$24 sps:$4 sm:$0xff]  }
 0x2a1   : > { %4619 = vmatpush1.bf16.msra.mxu0 %v6464_v51  ;;  %v6572_v51 = vld [vmem:[#allocation8 + $0x8d0] ss:$24 sps:$4 sm:$0xff]  }
 0x2a2   : > { %4620 = vmatprep.subr.bf16.mxu0 %v6469_v57  ;;  %v6580_v57 = vld [vmem:[#allocation8 + $0x14] ss:$24 sps:$4 sm:$0xff]  }
 0x2a3   : > { %4499 = vmatpush1.bf16.msra.mxu1 %v6500_v58  ;;  %v6527_v58 = vld [vmem:[#allocation8 + $0x758] ss:$24 sps:$4 sm:$0xff]  }
 0x2a4   : > { %4500 = vmatprep.subr.bf16.mxu1 %v6508_v59  ;;  %v6535_v59 = vld [vmem:[#allocation8 + $0x78c] ss:$24 sps:$4 sm:$0xff]  }
 0x2a5   : > { %4621 = vmatpush1.bf16.msra.mxu0 %v6467_v9  ;;  %v6533_v9 = vld [vmem:[#allocation8 + $0x788] ss:$24 sps:$4 sm:$0xff]  }
 0x2a6   : > { %4622 = vmatprep.subr.bf16.mxu0 %v6472_v60  ;;  %v6541_v60 = vld [vmem:[#allocation8 + $0x7bc] ss:$24 sps:$4 sm:$0xff]  }
 0x2a7   : > { %4501 = vmatpush1.bf16.msra.mxu1 %v6506_v61  ;;  %v6539_v61 = vld [vmem:[#allocation8 + $0x7b8] ss:$24 sps:$4 sm:$0xff]  }
 0x2a8   : > { %4502 = vmatprep.subr.bf16.mxu1 %v6514_v31  ;;  %v6547_v31 = vld [vmem:[#allocation8 + $0x7ec] ss:$24 sps:$4 sm:$0xff]  }
 0x2a9   : > { %4623 = vmatpush1.bf16.msra.mxu0 %v6470_v62  ;;  %v6545_v62 = vld [vmem:[#allocation8 + $0x7e8] ss:$24 sps:$4 sm:$0xff]  }
 0x2aa   : > { %4624 = vmatprep.subr.bf16.mxu0 %v6475_v63  ;;  %v6553_v63 = vld [vmem:[#allocation8 + $0x81c] ss:$24 sps:$4 sm:$0xff]  }
 0x2ab   : > { %4503 = vmatpush1.bf16.msra.mxu1 %v6512_v0  ;;  %v6551_v0 = vld [vmem:[#allocation8 + $0x818] ss:$24 sps:$4 sm:$0xff]  }
 0x2ac   : > { %4504 = vmatprep.subr.bf16.mxu1 %v6520_v1  ;;  %v6559_v1 = vld [vmem:[#allocation8 + $0x84c] ss:$24 sps:$4 sm:$0xff]  }
 0x2ad   : > { %4625 = vmatpush1.bf16.msra.mxu0 %v6473_v2  ;;  %v6557_v2 = vld [vmem:[#allocation8 + $0x848] ss:$24 sps:$4 sm:$0xff]  }
 0x2ae   : > { %4626 = vmatprep.subr.bf16.mxu0 %v6478_v37  ;;  %v6565_v37 = vld [vmem:[#allocation8 + $0x87c] ss:$24 sps:$4 sm:$0xff]  }
 0x2af   : > { %4505 = vmatpush1.bf16.msra.mxu1 %v6518_v3  ;;  %v6563_v3 = vld [vmem:[#allocation8 + $0x878] ss:$24 sps:$4 sm:$0xff]  }
 0x2b0   : > { %4506 = vmatprep.subr.bf16.mxu1 %v6526_v4  ;;  %v6571_v4 = vld [vmem:[#allocation8 + $0x8ac] ss:$24 sps:$4 sm:$0xff]  }
 0x2b1   : > { %4627 = vmatpush1.bf16.msra.mxu0 %v6476_v44  ;;  %v6569_v44 = vld [vmem:[#allocation8 + $0x8a8] ss:$24 sps:$4 sm:$0xff]  }
 0x2b2   : > { %4628 = vmatprep.subr.bf16.mxu0 %v6481_v5  ;;  %v6577_v5 = vld [vmem:[#allocation8 + $0x8dc] ss:$24 sps:$4 sm:$0xff]  }
 0x2b3   : > { %4507 = vmatpush1.bf16.msra.mxu1 %v6524_v6  ;;  %v6575_v6 = vld [vmem:[#allocation8 + $0x8d8] ss:$24 sps:$4 sm:$0xff]  }
 0x2b4   : > { %4508 = vmatprep.subr.bf16.mxu1 %v6532_v7  ;;  %v661_v7 = vsub.s32 4, %v7291_v50 }
 0x2b5   : > { %4629 = vmatpush1.bf16.msra.mxu0 %v6479_v49  ;;  %v665_v49 = vsub.s32 5, %v7291_v50 }
 0x2b6   : > { %4651 = vmatprep.subr.bf16.mxu0 %v6487_v55  ;;  %v662_v55 = vrot.slane %v7295_v10, %v661_v7 }
 0x2b7   : > { %4509 = vmatpush1.bf16.msra.mxu1 %v6530_v17  ;;  %v666_v17 = vrot.slane %v7295_v10, %v665_v49 }
 0x2b8   : > { %4631 = vmatmul.mubr.bf16.vlgmr.msra.gmra.mrb[16].mxu0 %v7325_v53  ;;  %4510 = vmatprep.subr.bf16.mxu1 %v6538_v18 }
 0x2b9   : > { %4640 = vmatprep.mubr.bf16.mxu0 %v7346_v32  ;;  %4652 = vmatpush1.bf16.msra.mxu0 %v6485_v19 }
 0x2ba   : > { %4653 = vmatprep.subr.bf16.mxu0 %v6493_v20 }
 0x2bb   : > { %4511 = vmatpush1.bf16.msra.mxu1 %v6536_v13 }
 0x2bc   : > { %4512 = vmatprep.subr.bf16.mxu1 %v6544_v21 }
 0x2bd   : > { %4654 = vmatpush1.bf16.msra.mxu0 %v6491_v22 }
 0x2be   : > { %4655 = vmatprep.subr.bf16.mxu0 %v6499_v24 }
 0x2bf   : > { %4513 = vmatpush1.bf16.msra.mxu1 %v6542_v25 }
 0x2c0   : > { %4641 = vmatmul.mubr.bf16.gmra.mrb[20].mxu0 %v7342_v28  ;;  %4514 = vmatprep.subr.bf16.mxu1 %v6550_v26 }
 0x2c1   : > { %4656 = vmatpush1.bf16.msra.mxu0 %v6497_v27 }
 0x2c2   : > { %4657 = vmatprep.subr.bf16.mxu0 %v6505_v15 }
 0x2c3   : > { %4515 = vmatpush1.bf16.msra.mxu1 %v6548_v16 }
 0x2c4   : > { %4516 = vmatprep.subr.bf16.mxu1 %v6556_v33 }
 0x2c5   : > { %4658 = vmatpush1.bf16.msra.mxu0 %v6503_v34 }
 0x2c6   : > { %4659 = vmatprep.subr.bf16.mxu0 %v6511_v35 }
 0x2c7   : > { %4517 = vmatpush1.bf16.msra.mxu1 %v6554_v36  ;;  %v6578_v36 = vld [vmem:[#allocation8 + $0x10] ss:$24 sps:$4 sm:$0xff]  }
 0x2c8   : > { %4518 = vmatprep.subr.bf16.mxu1 %v6562_v39 }
 0x2c9   : > { %4660 = vmatpush1.bf16.msra.mxu0 %v6509_v40  ;;  %v6583_v40 = vld [vmem:[#allocation8 + $0x44] ss:$24 sps:$4 sm:$0xff]  }
 0x2ca   : > { %4661 = vmatprep.subr.bf16.mxu0 %v6517_v23 }
 0x2cb   : > { %4519 = vmatpush1.bf16.msra.mxu1 %v6560_v41 }
 0x2cc   : > { %4520 = vmatprep.subr.bf16.mxu1 %v6568_v29 }
 0x2cd   : > { %4662 = vmatpush1.bf16.msra.mxu0 %v6515_v42 }
 0x2ce   : > { %4663 = vmatprep.subr.bf16.mxu0 %v6523_v43 }
 0x2cf   : > { %4521 = vmatpush1.bf16.msra.mxu1 %v6566_v47  ;;  %v6581_v47 = vld [vmem:[#allocation8 + $0x40] ss:$24 sps:$4 sm:$0xff]  }
 0x2d0   : > { %4522 = vmatprep.subr.bf16.mxu1 %v6574_v38 }
 0x2d1   : > { %4664 = vmatpush1.bf16.msra.mxu0 %v6521_v48 }
 0x2d2   : > { %4665 = vmatprep.subr.bf16.mxu0 %v6529_v45  ;;  %v6586_v45 = vld [vmem:[#allocation8 + $0x74] ss:$24 sps:$4 sm:$0xff]  }
 0x2d3   : > { %4523 = vmatpush1.bf16.msra.mxu1 %v6572_v51 }
 0x2d4   : > { %4704 = vmatprep.subr.bf16.mxu1 %v6580_v57 }
 0x2d5   : > { %4666 = vmatpush1.bf16.msra.mxu0 %v6527_v58 }
 0x2d6   : > { %4667 = vmatprep.subr.bf16.mxu0 %v6535_v59 }
 0x2d9   : > { %4668 = vmatpush1.bf16.msra.mxu0 %v6533_v9  ;;  %v6584_v9 = vld [vmem:[#allocation8 + $0x70] ss:$24 sps:$4 sm:$0xff]  }
 0x2da   : > { %4669 = vmatprep.subr.bf16.mxu0 %v6541_v60  ;;  %v6589_v60 = vld [vmem:[#allocation8 + $0xa4] ss:$24 sps:$4 sm:$0xff]  }
 0x2dd   : > { %4670 = vmatpush1.bf16.msra.mxu0 %v6539_v61  ;;  %v6587_v61 = vld [vmem:[#allocation8 + $0xa0] ss:$24 sps:$4 sm:$0xff]  }
 0x2de   : > { %4671 = vmatprep.subr.bf16.mxu0 %v6547_v31  ;;  %v6592_v31 = vld [vmem:[#allocation8 + $0xd4] ss:$24 sps:$4 sm:$0xff]  }
 0x2e1   : > { %4672 = vmatpush1.bf16.msra.mxu0 %v6545_v62  ;;  %v6590_v62 = vld [vmem:[#allocation8 + $0xd0] ss:$24 sps:$4 sm:$0xff]  }
 0x2e2   : > { %4673 = vmatprep.subr.bf16.mxu0 %v6553_v63  ;;  %v6595_v63 = vld [vmem:[#allocation8 + $0x104] ss:$24 sps:$4 sm:$0xff]  }
 0x2e5   : > { %4674 = vmatpush1.bf16.msra.mxu0 %v6551_v0  ;;  %v6593_v0 = vld [vmem:[#allocation8 + $0x100] ss:$24 sps:$4 sm:$0xff]  }
 0x2e6   : > { %4675 = vmatprep.subr.bf16.mxu0 %v6559_v1  ;;  %v6598_v1 = vld [vmem:[#allocation8 + $0x134] ss:$24 sps:$4 sm:$0xff]  }
 0x2e9   : > { %4676 = vmatpush1.bf16.msra.mxu0 %v6557_v2  ;;  %v6596_v2 = vld [vmem:[#allocation8 + $0x130] ss:$24 sps:$4 sm:$0xff]  }
 0x2ea   : > { %4677 = vmatprep.subr.bf16.mxu0 %v6565_v37  ;;  %v6601_v37 = vld [vmem:[#allocation8 + $0x164] ss:$24 sps:$4 sm:$0xff]  }
 0x2ed   : > { %4678 = vmatpush1.bf16.msra.mxu0 %v6563_v3  ;;  %v6599_v3 = vld [vmem:[#allocation8 + $0x160] ss:$24 sps:$4 sm:$0xff]  }
 0x2ee   : > { %4679 = vmatprep.subr.bf16.mxu0 %v6571_v4  ;;  %v6604_v4 = vld [vmem:[#allocation8 + $0x194] ss:$24 sps:$4 sm:$0xff]  }
 0x2f1   : > { %4680 = vmatpush1.bf16.msra.mxu0 %v6569_v44  ;;  %v6607_v44 = vld [vmem:[#allocation8 + $0x1c4] ss:$24 sps:$4 sm:$0xff]  }
 0x2f2   : > { %4681 = vmatprep.subr.bf16.mxu0 %v6577_v5  ;;  %v6605_v5 = vld [vmem:[#allocation8 + $0x1c0] ss:$24 sps:$4 sm:$0xff]  }
 0x2f5   : > { %4682 = vmatpush1.bf16.msra.mxu0 %v6575_v6  ;;  %v6610_v6 = vld [vmem:[#allocation8 + $0x1f4] ss:$24 sps:$4 sm:$0xff]  }
 0x30b   : > { %v2571_v18 = vpop.f32.mrb[8].mxu0 }
 0x30c   : > { %v5640_v19 = vadd.f32 %v2571_v18, %v662_v55  ;;  %v2573_v20 = vpop.f32.mrb[9].mxu0  ;;  %v6611_v18 = vld [vmem:[#allocation8 + $0x220] ss:$24 sps:$4 sm:$0xff]  }
 0x30d   : > { %v5641_v13 = vadd.f32 %v2573_v20, %v666_v17  ;;  %v2575_v21 = vpop.f32.mrb[10].mxu0  ;;  %v6614_v20 = vld [vmem:[#allocation8 + $0x250] ss:$24 sps:$4 sm:$0xff]  }
 0x30e   : > { %v5642_v22 = vadd.f32 %v2575_v21, %v662_v55  ;;  %v2577_v24 = vpop.f32.mrb[11].mxu0  ;;  %v2594_v26 = vmax.f32 %v5640_v19, 0.0  ;;  %v6616_v19 = vld [vmem:[#allocation8 + $0x254] ss:$24 sps:$4 sm:$0xff]   ;;  %v6617_v21 = vld [vmem:[#allocation8 + $0x280] ss:$24 sps:$4 sm:$0xff]  }
 0x30f   : > { %v5643_v25 = vadd.f32 %v2577_v24, %v666_v17  ;;  %v2595_v15 = vmax.f32 %v5641_v13, 0.0  ;;  %v6619_v13 = vld [vmem:[#allocation8 + $0x284] ss:$24 sps:$4 sm:$0xff]   ;;  %v6620_v24 = vld [vmem:[#allocation8 + $0x2b0] ss:$24 sps:$4 sm:$0xff]  }
 0x310   : > { %v2600_v27 = vmax.f32 %v5642_v22, 0.0  ;;  %v6622_v22 = vld [vmem:[#allocation8 + $0x2b4] ss:$24 sps:$4 sm:$0xff]  }
 0x311   : > { %v2601_v16 = vmax.f32 %v5643_v25, 0.0  ;;  %v6625_v25 = vld [vmem:[#allocation8 + $0x2e4] ss:$24 sps:$4 sm:$0xff]  }
 0x312   : > { %v7369_v33 = vpack.c.bf16 %v2600_v27, %v2594_v26  ;;  %v6623_v26 = vld [vmem:[#allocation8 + $0x2e0] ss:$24 sps:$4 sm:$0xff]   ;;  %v6628_v27 = vld [vmem:[#allocation8 + $0x314] ss:$24 sps:$4 sm:$0xff]  }
 0x313   : > { %v7371_v34 = vpack.c.bf16 %v2601_v16, %v2595_v15  ;;  %v2581_v35 = vpop.f32.mrb[12].mxu0  ;;  %v6626_v15 = vld [vmem:[#allocation8 + $0x310] ss:$24 sps:$4 sm:$0xff]   ;;  %v6631_v16 = vld [vmem:[#allocation8 + $0x344] ss:$24 sps:$4 sm:$0xff]  }
 0x314   : > { %v5644_v39 = vadd.f32 %v2581_v35, %v662_v55  ;;  %v2583_v10 = vpop.f32.mrb[13].mxu0  ;;  %v6629_v35 = vld [vmem:[#allocation8 + $0x340] ss:$24 sps:$4 sm:$0xff]  }
 0x315   : > { %v5645_v23 = vadd.f32 %v2583_v10, %v666_v17  ;;  %v2585_v41 = vpop.f32.mrb[14].mxu0  ;;  %4524 = vmatprep.mubr.bf16.mxu1 %v7371_v34  ;;  %4683 = vmatprep.mubr.bf16.mxu0 %v7371_v34  ;;  %v6637_v10 = vld [vmem:[#allocation8 + $0x3a4] ss:$24 sps:$4 sm:$0xff]  }
 0x316   : > { %v5646_v29 = vadd.f32 %v2585_v41, %v662_v55  ;;  %v2587_v42 = vpop.f32.mrb[15].mxu0  ;;  %4525 = vmatmul.mubr.bf16.vlgmr.msra.gmra.mrb[8].mxu1 %v7369_v33  ;;  %4684 = vmatmul.mubr.bf16.vlgmr.msra.gmra.mrb[16].mxu0 %v7369_v33  ;;  %v2606_v38 = vmax.f32 %v5644_v39, 0.0  ;;  %v6608_v55 = vld [vmem:[#allocation8 + $0x1f0] ss:$24 sps:$4 sm:$0xff]   ;;  %v6641_v41 = vld [vmem:[#allocation8 + $0x400] ss:$24 sps:$4 sm:$0xff]  }
 0x317   : > { %v5647_v43 = vadd.f32 %v2587_v42, %v666_v17  ;;  %4705 = vmatpush1.bf16.msra.mxu1 %v6578_v36  ;;  %v2607_v51 = vmax.f32 %v5645_v23, 0.0  ;;  %v6613_v17 = vld [vmem:[#allocation8 + $0x224] ss:$24 sps:$4 sm:$0xff]   ;;  %v6634_v36 = vld [vmem:[#allocation8 + $0x374] ss:$24 sps:$4 sm:$0xff]  }
 0x318   : > { %v2612_v48 = vmax.f32 %v5646_v29, 0.0  ;;  %4706 = vmatprep.subr.bf16.mxu1 %v6583_v40  ;;  %v6632_v39 = vld [vmem:[#allocation8 + $0x370] ss:$24 sps:$4 sm:$0xff]   ;;  %v6635_v40 = vld [vmem:[#allocation8 + $0x3a0] ss:$24 sps:$4 sm:$0xff]  }
 0x319   : > { %v2613_v57 = vmax.f32 %v5647_v43, 0.0  ;;  %v6640_v23 = vld [vmem:[#allocation8 + $0x3d4] ss:$24 sps:$4 sm:$0xff]   ;;  %v6644_v42 = vld [vmem:[#allocation8 + $0x430] ss:$24 sps:$4 sm:$0xff]  }
 0x31a   : > { %v7377_v58 = vpack.c.bf16 %v2612_v48, %v2606_v38  ;;  %v6646_v29 = vld [vmem:[#allocation8 + $0x434] ss:$24 sps:$4 sm:$0xff]   ;;  %v6649_v43 = vld [vmem:[#allocation8 + $0x464] ss:$24 sps:$4 sm:$0xff]   ;;  %v6653_v48 = vld [vmem:[#allocation8 + $0x4c0] ss:$24 sps:$4 sm:$0xff]  }
 0x31b   : > { %v7379_v59 = vpack.c.bf16 %v2613_v57, %v2607_v51  ;;  %4707 = vmatpush1.bf16.msra.mxu1 %v6581_v47  ;;  %v6652_v47 = vld [vmem:[#allocation8 + $0x494] ss:$24 sps:$4 sm:$0xff]   ;;  %v6655_v38 = vld [vmem:[#allocation8 + $0x4c4] ss:$24 sps:$4 sm:$0xff]   ;;  %v6656_v51 = vld [vmem:[#allocation8 + $0x4f0] ss:$24 sps:$4 sm:$0xff]  }
 0x31c   : > { %4708 = vmatprep.subr.bf16.mxu1 %v6586_v45  ;;  %v6658_v45 = vld [vmem:[#allocation8 + $0x4f4] ss:$24 sps:$4 sm:$0xff]   ;;  %v6661_v57 = vld [vmem:[#allocation8 + $0x524] ss:$24 sps:$4 sm:$0xff]  }
 0x31d   : > { %4534 = vmatprep.mubr.bf16.mxu1 %v7379_v59  ;;  %4693 = vmatprep.mubr.bf16.mxu0 %v7379_v59 }
 0x31e   : > { %4535 = vmatmul.mubr.bf16.gmra.mrb[12].mxu1 %v7377_v58  ;;  %4694 = vmatmul.mubr.bf16.gmra.mrb[20].mxu0 %v7377_v58 }
 0x31f   : > { %4709 = vmatpush1.bf16.msra.mxu1 %v6584_v9  ;;  %4736 = vmatprep.mubr.bf16.mxu1 %v7327_v54  ;;  %v6602_v54 = vld [vmem:[#allocation8 + $0x190] ss:$24 sps:$4 sm:$0xff]   ;;  %v6659_v9 = vld [vmem:[#allocation8 + $0x520] ss:$24 sps:$4 sm:$0xff]  }
 0x320   : > { %4710 = vmatprep.subr.bf16.mxu1 %v6589_v60  ;;  %v6664_v60 = vld [vmem:[#allocation8 + $0x554] ss:$24 sps:$4 sm:$0xff]  }
 0x323   : > { %4711 = vmatpush1.bf16.msra.mxu1 %v6587_v61  ;;  %v6662_v61 = vld [vmem:[#allocation8 + $0x550] ss:$24 sps:$4 sm:$0xff]  }
 0x324   : > { %4712 = vmatprep.subr.bf16.mxu1 %v6592_v31  ;;  %v6667_v31 = vld [vmem:[#allocation8 + $0x584] ss:$24 sps:$4 sm:$0xff]  }
 0x327   : > { %4713 = vmatpush1.bf16.msra.mxu1 %v6590_v62  ;;  %v6665_v62 = vld [vmem:[#allocation8 + $0x580] ss:$24 sps:$4 sm:$0xff]  }
 0x328   : > { %4714 = vmatprep.subr.bf16.mxu1 %v6595_v63  ;;  %v6670_v63 = vld [vmem:[#allocation8 + $0x5b4] ss:$24 sps:$4 sm:$0xff]  }
 0x32b   : > { %4715 = vmatpush1.bf16.msra.mxu1 %v6593_v0  ;;  %v6668_v0 = vld [vmem:[#allocation8 + $0x5b0] ss:$24 sps:$4 sm:$0xff]  }
 0x32c   : > { %4716 = vmatprep.subr.bf16.mxu1 %v6598_v1  ;;  %v6673_v1 = vld [vmem:[#allocation8 + $0x5e4] ss:$24 sps:$4 sm:$0xff]  }
 0x32f   : > { %4717 = vmatpush1.bf16.msra.mxu1 %v6596_v2  ;;  %v6671_v2 = vld [vmem:[#allocation8 + $0x5e0] ss:$24 sps:$4 sm:$0xff]  }
 0x330   : > { %4718 = vmatprep.subr.bf16.mxu1 %v6601_v37  ;;  %v6676_v37 = vld [vmem:[#allocation8 + $0x614] ss:$24 sps:$4 sm:$0xff]  }
 0x333   : > { %4719 = vmatpush1.bf16.msra.mxu1 %v6599_v3  ;;  %v6674_v3 = vld [vmem:[#allocation8 + $0x610] ss:$24 sps:$4 sm:$0xff]  }
 0x334   : > { %4720 = vmatprep.subr.bf16.mxu1 %v6604_v4  ;;  %v6679_v4 = vld [vmem:[#allocation8 + $0x644] ss:$24 sps:$4 sm:$0xff]  }
 0x337   : > { %4721 = vmatpush1.bf16.msra.mxu1 %v6602_v54  ;;  %v6677_v54 = vld [vmem:[#allocation8 + $0x640] ss:$24 sps:$4 sm:$0xff]  }
 0x338   : > { %4722 = vmatprep.subr.bf16.mxu1 %v6607_v44  ;;  %v6682_v44 = vld [vmem:[#allocation8 + $0x674] ss:$24 sps:$4 sm:$0xff]  }
 0x33b   : > { %4723 = vmatpush1.bf16.msra.mxu1 %v6605_v5  ;;  %v6680_v5 = vld [vmem:[#allocation8 + $0x670] ss:$24 sps:$4 sm:$0xff]  }
 0x33c   : > { %4724 = vmatprep.subr.bf16.mxu1 %v6610_v6  ;;  %v6685_v6 = vld [vmem:[#allocation8 + $0x6a4] ss:$24 sps:$4 sm:$0xff]  }
 0x33f   : > { %4725 = vmatpush1.bf16.msra.mxu1 %v6608_v55  ;;  %v6683_v55 = vld [vmem:[#allocation8 + $0x6a0] ss:$24 sps:$4 sm:$0xff]  }
 0x340   : > { %4726 = vmatprep.subr.bf16.mxu1 %v6613_v17  ;;  %v6688_v17 = vld [vmem:[#allocation8 + $0x6d4] ss:$24 sps:$4 sm:$0xff]  }
 0x343   : > { %4727 = vmatpush1.bf16.msra.mxu1 %v6611_v18  ;;  %v6689_v18 = vld [vmem:[#allocation8 + $0x700] ss:$24 sps:$4 sm:$0xff]  }
 0x344   : > { %4728 = vmatprep.subr.bf16.mxu1 %v6616_v19  ;;  %v6694_v19 = vld [vmem:[#allocation8 + $0x734] ss:$24 sps:$4 sm:$0xff]  }
 0x347   : > { %4729 = vmatpush1.bf16.msra.mxu1 %v6614_v20  ;;  %v6692_v20 = vld [vmem:[#allocation8 + $0x730] ss:$24 sps:$4 sm:$0xff]  }
 0x348   : > { %4730 = vmatprep.subr.bf16.mxu1 %v6619_v13  ;;  %v6697_v13 = vld [vmem:[#allocation8 + $0x764] ss:$24 sps:$4 sm:$0xff]  }
 0x34b   : > { %4731 = vmatpush1.bf16.msra.mxu1 %v6617_v21  ;;  %v6700_v21 = vld [vmem:[#allocation8 + $0x794] ss:$24 sps:$4 sm:$0xff]  }
 0x34c   : > { %4732 = vmatprep.subr.bf16.mxu1 %v6622_v22  ;;  %v6703_v22 = vld [vmem:[#allocation8 + $0x7c4] ss:$24 sps:$4 sm:$0xff]  }
 0x34f   : > { %4733 = vmatpush1.bf16.msra.mxu1 %v6620_v24  ;;  %v6701_v24 = vld [vmem:[#allocation8 + $0x7c0] ss:$24 sps:$4 sm:$0xff]  }
 0x350   : > { %4734 = vmatprep.subr.bf16.mxu1 %v6625_v25  ;;  %v6706_v25 = vld [vmem:[#allocation8 + $0x7f4] ss:$24 sps:$4 sm:$0xff]  }
 0x353   : > { %4735 = vmatpush1.bf16.msra.mxu1 %v6623_v26  ;;  %v6704_v26 = vld [vmem:[#allocation8 + $0x7f0] ss:$24 sps:$4 sm:$0xff]  }
 0x354   : > { %4757 = vmatprep.subr.bf16.mxu1 %v6628_v27  ;;  %v6709_v27 = vld [vmem:[#allocation8 + $0x824] ss:$24 sps:$4 sm:$0xff]  }
 0x356   : > { %4737 = vmatmul.mubr.bf16.vlgmr.msra.gmra.mrb[16].mxu1 %v7323_v52  ;;  %v6638_v52 = vld [vmem:[#allocation8 + $0x3d0] ss:$24 sps:$4 sm:$0xff]  }
 0x357   : > { %4746 = vmatprep.mubr.bf16.mxu1 %v7344_v30  ;;  %4758 = vmatpush1.bf16.msra.mxu1 %v6626_v15  ;;  %v6643_v30 = vld [vmem:[#allocation8 + $0x404] ss:$24 sps:$4 sm:$0xff]   ;;  %v6707_v15 = vld [vmem:[#allocation8 + $0x820] ss:$24 sps:$4 sm:$0xff]  }
 0x358   : > { %4759 = vmatprep.subr.bf16.mxu1 %v6631_v16  ;;  %v6712_v16 = vld [vmem:[#allocation8 + $0x854] ss:$24 sps:$4 sm:$0xff]  }
 0x35b   : > { %4760 = vmatpush1.bf16.msra.mxu1 %v6629_v35  ;;  %v6710_v35 = vld [vmem:[#allocation8 + $0x850] ss:$24 sps:$4 sm:$0xff]  }
 0x35c   : > { %4761 = vmatprep.subr.bf16.mxu1 %v6634_v36  ;;  %v6715_v36 = vld [vmem:[#allocation8 + $0x884] ss:$24 sps:$4 sm:$0xff]  }
 0x35e   : > { %4747 = vmatmul.mubr.bf16.gmra.mrb[20].mxu1 %v7340_v14  ;;  %v6647_v14 = vld [vmem:[#allocation8 + $0x460] ss:$24 sps:$4 sm:$0xff]  }
 0x35f   : > { %4762 = vmatpush1.bf16.msra.mxu1 %v6632_v39  ;;  %4789 = vmatprep.mubr.bf16.mxu1 %v7329_v56  ;;  %v6650_v56 = vld [vmem:[#allocation8 + $0x490] ss:$24 sps:$4 sm:$0xff]   ;;  %v6713_v39 = vld [vmem:[#allocation8 + $0x880] ss:$24 sps:$4 sm:$0xff]  }
 0x360   : > { %4763 = vmatprep.subr.bf16.mxu1 %v6637_v10  ;;  %v6718_v10 = vld [vmem:[#allocation8 + $0x8b4] ss:$24 sps:$4 sm:$0xff]  }
 0x363   : > { %4764 = vmatpush1.bf16.msra.mxu1 %v6635_v40  ;;  %v6716_v40 = vld [vmem:[#allocation8 + $0x8b0] ss:$24 sps:$4 sm:$0xff]  }
 0x364   : > { %4765 = vmatprep.subr.bf16.mxu1 %v6640_v23  ;;  %v6721_v23 = vld [vmem:[#allocation8 + $0x8e4] ss:$24 sps:$4 sm:$0xff]  }
 0x367   : > { %4766 = vmatpush1.bf16.msra.mxu1 %v6638_v52  ;;  %v6719_v52 = vld [vmem:[#allocation8 + $0x8e0] ss:$24 sps:$4 sm:$0xff]  }
 0x368   : > { %4767 = vmatprep.subr.bf16.mxu1 %v6643_v30  ;;  %v2914_v30 = vld [vmem:[#allocation10] sm:$0x3f] }
 0x36b   : > { %4768 = vmatpush1.bf16.msra.mxu1 %v6641_v41  ;;  %v2919_v41 = vrot.slane %v2914_v30, %v645_v46 }
 0x36c   : > { %4769 = vmatprep.subr.bf16.mxu1 %v6646_v29  ;;  %v2927_v29 = vrot.slane %v2914_v30, %v653_v8 }
 0x36f   : > { %4770 = vmatpush1.bf16.msra.mxu1 %v6644_v42  ;;  %v2923_v42 = vrot.slane %v2914_v30, %v649_v11 }
 0x370   : > { %4771 = vmatprep.subr.bf16.mxu1 %v6649_v43  ;;  %v2931_v43 = vrot.slane %v2914_v30, %v657_v12 }
 0x373   : > { %4772 = vmatpush1.bf16.msra.mxu1 %v6647_v14 }
 0x374   : > { %4773 = vmatprep.subr.bf16.mxu1 %v6652_v47 }
 0x377   : > { %4774 = vmatpush1.bf16.msra.mxu1 %v6650_v56 }
 0x378   : > { %4775 = vmatprep.subr.bf16.mxu1 %v6655_v38 }
 0x37b   : > { %4776 = vmatpush1.bf16.msra.mxu1 %v6653_v48 }
 0x37c   : > { %4777 = vmatprep.subr.bf16.mxu1 %v6658_v45 }
 0x37f   : > { %4778 = vmatpush1.bf16.msra.mxu1 %v6656_v51 }
 0x380   : > { %4779 = vmatprep.subr.bf16.mxu1 %v6661_v57 }
 0x383   : > { %4780 = vmatpush1.bf16.msra.mxu1 %v6659_v9 }
 0x384   : > { %4781 = vmatprep.subr.bf16.mxu1 %v6664_v60 }
 0x387   : > { %4782 = vmatpush1.bf16.msra.mxu1 %v6662_v61 }
 0x388   : > { %4783 = vmatprep.subr.bf16.mxu1 %v6667_v31 }
 0x38b   : > { %4784 = vmatpush1.bf16.msra.mxu1 %v6665_v62 }
 0x38c   : > { %4785 = vmatprep.subr.bf16.mxu1 %v6670_v63 }
 0x38f   : > { %4786 = vmatpush1.bf16.msra.mxu1 %v6668_v0 }
 0x390   : > { %4787 = vmatprep.subr.bf16.mxu1 %v6673_v1 }
 0x393   : > { %4788 = vmatpush1.bf16.msra.mxu1 %v6671_v2 }
 0x394   : > { %4810 = vmatprep.subr.bf16.mxu1 %v6676_v37 }
 0x396   : > { %4790 = vmatmul.mubr.bf16.vlgmr.msra.gmra.mrb[16].mxu1 %v7325_v53  ;;  %v6686_v53 = vld [vmem:[#allocation8 + $0x6d0] ss:$24 sps:$4 sm:$0xff]  }
 0x397   : > { %4799 = vmatprep.mubr.bf16.mxu1 %v7346_v32  ;;  %4811 = vmatpush1.bf16.msra.mxu1 %v6674_v3  ;;  %v6691_v32 = vld [vmem:[#allocation8 + $0x704] ss:$24 sps:$4 sm:$0xff]  }
 0x398   : > { %4812 = vmatprep.subr.bf16.mxu1 %v6679_v4 }
 0x39b   : > { %4813 = vmatpush1.bf16.msra.mxu1 %v6677_v54 }
 0x39c   : > { %4814 = vmatprep.subr.bf16.mxu1 %v6682_v44 }
 0x39e   : > { %4800 = vmatmul.mubr.bf16.gmra.mrb[20].mxu1 %v7342_v28  ;;  %v6695_v28 = vld [vmem:[#allocation8 + $0x760] ss:$24 sps:$4 sm:$0xff]  }
 0x39f   : > { %4815 = vmatpush1.bf16.msra.mxu1 %v6680_v5  ;;  %4842 = vmatprep.mubr.bf16.mxu1 %v7371_v34  ;;  %v6698_v34 = vld [vmem:[#allocation8 + $0x790] ss:$24 sps:$4 sm:$0xff]  }
 0x3a0   : > { %4816 = vmatprep.subr.bf16.mxu1 %v6685_v6 }
 0x3a3   : > { %4817 = vmatpush1.bf16.msra.mxu1 %v6683_v55 }
 0x3a4   : > { %4818 = vmatprep.subr.bf16.mxu1 %v6688_v17  ;;  %v2935_v17 = vrot.slane %v2914_v30, %v661_v7 }
 0x3a7   : > { %4819 = vmatpush1.bf16.msra.mxu1 %v6686_v53  ;;  %v2939_v53 = vrot.slane %v2914_v30, %v665_v49 }
 0x3a8   : > { %4820 = vmatprep.subr.bf16.mxu1 %v6691_v32 }
 0x3ab   : > { %4821 = vmatpush1.bf16.msra.mxu1 %v6689_v18 }
 0x3ac   : > { %4822 = vmatprep.subr.bf16.mxu1 %v6694_v19 }
 0x3af   : > { %4823 = vmatpush1.bf16.msra.mxu1 %v6692_v20 }
 0x3b0   : > { %4824 = vmatprep.subr.bf16.mxu1 %v6697_v13 }
 0x3b3   : > { %4825 = vmatpush1.bf16.msra.mxu1 %v6695_v28 }
 0x3b4   : > { %4826 = vmatprep.subr.bf16.mxu1 %v6700_v21 }
 0x3b7   : > { %4827 = vmatpush1.bf16.msra.mxu1 %v6698_v34 }
 0x3b8   : > { %4828 = vmatprep.subr.bf16.mxu1 %v6703_v22 }
 0x3bb   : > { %4829 = vmatpush1.bf16.msra.mxu1 %v6701_v24 }
 0x3bc   : > { %4830 = vmatprep.subr.bf16.mxu1 %v6706_v25 }
 0x3bf   : > { %4831 = vmatpush1.bf16.msra.mxu1 %v6704_v26 }
 0x3c0   : > { %4832 = vmatprep.subr.bf16.mxu1 %v6709_v27 }
 0x3c3   : > { %4833 = vmatpush1.bf16.msra.mxu1 %v6707_v15 }
 0x3c4   : > { %4834 = vmatprep.subr.bf16.mxu1 %v6712_v16 }
 0x3c7   : > { %4835 = vmatpush1.bf16.msra.mxu1 %v6710_v35 }
 0x3c8   : > { %4836 = vmatprep.subr.bf16.mxu1 %v6715_v36 }
 0x3cb   : > { %4837 = vmatpush1.bf16.msra.mxu1 %v6713_v39 }
 0x3cc   : > { %4838 = vmatprep.subr.bf16.mxu1 %v6718_v10 }
 0x3cf   : > { %4839 = vmatpush1.bf16.msra.mxu1 %v6716_v40 }
 0x3d0   : > { %4840 = vmatprep.subr.bf16.mxu1 %v6721_v23 }
 0x3d3   : > { %4841 = vmatpush1.bf16.msra.mxu1 %v6719_v52 }
 0x3d6   : > { %4843 = vmatmul.mubr.bf16.vlgmr.msra.gmra.mrb[16].mxu1 %v7369_v33 }
 0x3d7   : > { %4852 = vmatprep.mubr.bf16.mxu1 %v7379_v59 }
 0x3de   : > { %4853 = vmatmul.mubr.bf16.gmra.mrb[20].mxu1 %v7377_v58 }
 0x3e9   : > { %v4526_v14 = vpop.f32.mrb[8].mxu1  ;;  %v4685_v33 = vpop.f32.mrb[16].mxu0 }
 0x3ea   : > { %v5648_v47 = vadd.f32 %v4526_v14, %v2919_v41  ;;  %v5656_v59 = vadd.f32 %v4685_v33, %v2927_v29  ;;  %v4528_v56 = vpop.f32.mrb[9].mxu1  ;;  %v4687_v58 = vpop.f32.mrb[17].mxu0 }
 0x3eb   : > { %v5649_v38 = vadd.f32 %v4528_v56, %v2923_v42  ;;  %v5657_v48 = vadd.f32 %v4687_v58, %v2931_v43  ;;  %v4530_v45 = vpop.f32.mrb[10].mxu1  ;;  %v4689_v51 = vpop.f32.mrb[18].mxu0 }
 0x3ec   : > { %4863 = vst [vmem:[%s7407_s29] sm:$0xff] %v5648_v47  ;;  %4865 = vst [vmem:[%s7407_s29 + $0x10] sm:$0xff] %v5656_v59  ;;  %v5650_v46 = vadd.f32 %v4530_v45, %v2919_v41  ;;  %v5658_v8 = vadd.f32 %v4689_v51, %v2927_v29  ;;  %v4532_v11 = vpop.f32.mrb[11].mxu1  ;;  %v4691_v12 = vpop.f32.mrb[19].mxu0 }
 0x3ed   : > { %4864 = vst [vmem:[%s7407_s29 + $0x8] sm:$0xff] %v5649_v38  ;;  %4866 = vst [vmem:[%s7407_s29 + $0x18] sm:$0xff] %v5657_v48  ;;  %v5651_v57 = vadd.f32 %v4532_v11, %v2923_v42  ;;  %v5659_v9 = vadd.f32 %v4691_v12, %v2931_v43 }
 0x3ee   : > { %4869 = vst [vmem:[%s7407_s29 + $0x30] sm:$0xff] %v5650_v46  ;;  %4871 = vst [vmem:[%s7407_s29 + $0x40] sm:$0xff] %v5658_v8 }
 0x3ef   : > { %4870 = vst [vmem:[%s7407_s29 + $0x38] sm:$0xff] %v5651_v57  ;;  %4872 = vst [vmem:[%s7407_s29 + $0x48] sm:$0xff] %v5659_v9 }
 0x3f1   : > { %v4536_v60 = vpop.f32.mrb[12].mxu1  ;;  %v4695_v61 = vpop.f32.mrb[20].mxu0 }
 0x3f2   : > { %v5652_v31 = vadd.f32 %v4536_v60, %v2919_v41  ;;  %v5660_v62 = vadd.f32 %v4695_v61, %v2927_v29  ;;  %v4538_v63 = vpop.f32.mrb[13].mxu1  ;;  %v4697_v0 = vpop.f32.mrb[21].mxu0 }
 0x3f3   : > { %v5653_v1 = vadd.f32 %v4538_v63, %v2923_v42  ;;  %v5661_v2 = vadd.f32 %v4697_v0, %v2931_v43  ;;  %v4540_v37 = vpop.f32.mrb[14].mxu1  ;;  %v4699_v3 = vpop.f32.mrb[22].mxu0 }
 0x3f4   : > { %4875 = vst [vmem:[%s7407_s29 + $0x60] sm:$0xff] %v5652_v31  ;;  %4877 = vst [vmem:[%s7407_s29 + $0x70] sm:$0xff] %v5660_v62  ;;  %v5654_v4 = vadd.f32 %v4540_v37, %v2919_v41  ;;  %v5662_v54 = vadd.f32 %v4699_v3, %v2927_v29  ;;  %v4542_v44 = vpop.f32.mrb[15].mxu1  ;;  %v4701_v5 = vpop.f32.mrb[23].mxu0 }
 0x3f5   : > { %4876 = vst [vmem:[%s7407_s29 + $0x68] sm:$0xff] %v5653_v1  ;;  %4878 = vst [vmem:[%s7407_s29 + $0x78] sm:$0xff] %v5661_v2  ;;  %v5655_v6 = vadd.f32 %v4542_v44, %v2923_v42  ;;  %v5663_v55 = vadd.f32 %v4701_v5, %v2931_v43 }
 0x3f6   : > { %4881 = vst [vmem:[%s7407_s29 + $0x90] sm:$0xff] %v5654_v4  ;;  %4883 = vst [vmem:[%s7407_s29 + $0xa0] sm:$0xff] %v5662_v54 }
 0x3f7   : > { %4882 = vst [vmem:[%s7407_s29 + $0x98] sm:$0xff] %v5655_v6  ;;  %4884 = vst [vmem:[%s7407_s29 + $0xa8] sm:$0xff] %v5663_v55 }
 0x4a9   : > { %v4844_v32 = vpop.f32.mrb[16].mxu1 }
 0x4aa   : > { %v5664_v18 = vadd.f32 %v4844_v32, %v2935_v17  ;;  %v4846_v19 = vpop.f32.mrb[17].mxu1 }
 0x4ab   : > { %v5665_v20 = vadd.f32 %v4846_v19, %v2939_v53  ;;  %v4848_v13 = vpop.f32.mrb[18].mxu1 }
 0x4ac   : > { %4867 = vst [vmem:[%s7407_s29 + $0x20] sm:$0xff] %v5664_v18  ;;  %v5666_v28 = vadd.f32 %v4848_v13, %v2935_v17  ;;  %v4850_v21 = vpop.f32.mrb[19].mxu1 }
 0x4ad   : > { %4868 = vst [vmem:[%s7407_s29 + $0x28] sm:$0xff] %v5665_v20  ;;  %v5667_v34 = vadd.f32 %v4850_v21, %v2939_v53 }
 0x4ae   : > { %4873 = vst [vmem:[%s7407_s29 + $0x50] sm:$0xff] %v5666_v28 }
 0x4af   : > { %4874 = vst [vmem:[%s7407_s29 + $0x58] sm:$0xff] %v5667_v34 }
 0x4b1   : > { %v4854_v7 = vpop.f32.mrb[20].mxu1  ;;  %4894 = sbr.rel (!%p7531_p1) target bundleno = 1237 (0x4d5), region = 64 }
 0x4b2   : > { %v5668_v50 = vadd.f32 %v4854_v7, %v2935_v17  ;;  %v4856_v49 = vpop.f32.mrb[21].mxu1 }
 0x4b3   : > { %v5669_v22 = vadd.f32 %v4856_v49, %v2939_v53  ;;  %v4858_v24 = vpop.f32.mrb[22].mxu1 }
 0x4b4   : > { %4879 = vst [vmem:[%s7407_s29 + $0x80] sm:$0xff] %v5668_v50  ;;  %v5670_v25 = vadd.f32 %v4858_v24, %v2935_v17  ;;  %v4860_v26 = vpop.f32.mrb[23].mxu1 }
 0x4b5   : > { %4880 = vst [vmem:[%s7407_s29 + $0x88] sm:$0xff] %v5669_v22  ;;  %v5671_v27 = vadd.f32 %v4860_v26, %v2939_v53 }
 0x4b6   : > { %4885 = vst [vmem:[%s7407_s29 + $0xb0] sm:$0xff] %v5670_v25 }
 0x4b7   : > { %4886 = vst [vmem:[%s7407_s29 + $0xb8] sm:$0xff] %v5671_v27 }
 0x4b8   : > { %s7542_s11 = smov (!%p4897_p6, %s4896_s11), 4 }
 0x4b9   : > { %s7441_s13 = smul.u32 768, %s7542_s11 }
 0x4bb   : > { %s4902_s16 = ssub.s32 3072, %s7441_s13 }
 0x4bc   : > { %4903 = vsyncadd %s4888_s7, %s4902_s16  ;;  %p5618_p3 = scmp.ne.s32.totalorder %s7441_s13, 0  ;;  %s5771_s30 = smul.u32 3072, %s7001_s22 }
 0x4bd   : > { %s4909_s8 = sshll.u32 %s7407_s29, 4  ;;  %s6947_s12 = smov [#allocation11]   ;;  %s7454_s8 = int_to_ptr.vmem [resolvable:$true] %s4909_s8 }
 0x4be   : > { %s7452_s23 = scalar_lea.hbm %s7505_s5, %s5771_s30  ;;  %s6862_s24 = scalar_lea.vmem %s7454_s8, %s7441_s13 }
 0x4bf   : > { %p6863_p5 = scmp.ne.s32.totalorder %s7454_s8, %s6862_s24  ;;  %s6866_s1 = sshll.u32 %s6947_s12, 4  ;;  %s6867_s1 = int_to_ptr.vmem [resolvable:$false] %s6866_s1 }
 0x4c0   : > { %s6868_s22 = scalar_lea.vmem %s6867_s1, 6144  ;;  %p6869_p0 = scmp.lt.s32.totalorder %s7454_s8, %s6867_s1 }
 0x4c1   : > { %p6864_p11 = pnand %p6863_p5, %p5618_p3  ;;  %p6870_p12 = scmp.lt.s32.totalorder %s6868_s22, %s6862_s24 }
 0x4c3   : > { %p6865_p13 = pneg %p6864_p11  ;;  %p6871_p7 = por %p6870_p12, %p6869_p0 }
 0x4c5   : > { %p6872_p2 = pnand %p6871_p7, %p6865_p13 }
 0x4c7   : > { %6875 = shalt.err (!%p6872_p2)
}
 0x4c8   : > { %s6876_s17 = scalar_lea.hbm %s7452_s23, %s7441_s13  ;;  %s6880_s14 = scalar_lea.hbm %s7505_s5, 3840 }
 0x4c9   : > { %p6877_p8 = scmp.ne.s32.totalorder %s7452_s23, %s6876_s17  ;;  %p6881_p1 = scmp.lt.u32.totalorder %s7452_s23, %s7505_s5 }
 0x4ca   : > { %p6882_p6 = scmp.lt.u32.totalorder %s6880_s14, %s6876_s17  ;;  %p6884_p11 = scmp.lt.u32.totalorder %s6876_s17, %s7452_s23 }
 0x4cb   : > { %p6878_p9 = pnand %p6877_p8, %p5618_p3 }
 0x4cc   : > { %p6883_p5 = por %p6882_p6, %p6881_p1 }
 0x4cd   : > { %p6879_p10 = pneg %p6878_p9 }
 0x4ce   : > { %p6885_p13 = por %p6884_p11, %p6883_p5 }
 0x4d0   : > { %p6886_p0 = pnand %p6885_p13, %p6879_p10 }
 0x4d2   : > { %6889 = shalt.err (!%p6886_p0)
}
 0x4d3   : > { %s6948_s29 = smov 768   ;;  %s6949_s10 = smov 48  }
 0x4d4   : > { %4915 = dma.vmem_to_hbm [thread:$0]  (%p5618_p3), %s7454_s8, %s7441_s13, %s7452_s23, %s4888_s7, %s6948_s29, %s6948_s29, %s6949_s10  }
 0x4d5 PF: > { %s7532_s11 = sld [smem:[#allocation18_spill]]  ;;  %s4924_s16 = sand.u32 1, %s6924_s18  }
 0x4d6   : > { %s4925_s30 = scalar_lea.sflag [#allocation4], %s4924_s16 }
 0x4db   : > { %p7533_p12 = scmp.ne.s32.totalorder %s7532_s11, 0 }
 0x4dd   : > { %p5804_p7 = pnand %p5026_p4, %p7533_p12 }
 0x4df   : > { %6919 = dma.done.wait (!%p5804_p7), %s4925_s30, 3072  }
 0x4e0   : > { %6921 = vsyncadd (!%p5804_p7), %s4925_s30, 4294964224  ;;  %s7534_s21 = sld [smem:[#allocation16_spill]]  ;;  %s7535_s15 = sld [smem:[#allocation17_spill]] }
 0x4e1   : > { %s7536_s18 = smov %s6928_s19  ;;  %s7537_s19 = smov %s6932_s20 }
 0x4e6   : > { %p20_p2 = scmp.ge.s32.totalorder %s7534_s21, 4   ;;  %s7538_s20 = smov %s7535_s15 }
 0x4e8   :  { %22 = sbr.rel (!%p20_p2) target bundleno = 9 (0x9), region = 101 }
 0x4ef   :  { %4930 = vsyncpa [#allocation3], 1 }
 0x4f0   :  { %4932 = vsyncpa [#allocation3 + $0x1], 1 }
 0x4f1   :  { %4933 = vsyncpa [#allocation6], 1 }
 0x4f2   :  { %4934 = vsyncpa [#allocation9], 1 }
 0x4f3   :  { %4935 = vsyncpa [#allocation4], 1 }
 0x4f4   :  { %4937 = vsyncpa [#allocation4 + $0x1], 1 }

</bundles_post_ra>
